<compile_context>
chip_gen: v7x
topology: tpu7x:2x2x1
jax: 0.10.0
libtpu: 0.0.40
codegen_flags: <defaults>
</compile_context>

<pallas_src>
import jax
import jax.numpy as jnp
from jax.experimental import pallas as pl
from jax.experimental.pallas import tpu as pltpu

EPS = 1e-5           # nn.BatchNorm1d default eps
NEG_SLOPE = 0.8      # LeakyReLU(0.8)
ROWS_TARGET = 128    # rows per grid step: fills MXU rows & gives 128-lane output


def _mlp_kernel(x_ref,
                w1_ref, g1_ref, be1_ref,
                w2_ref, g2_ref, be2_ref,
                w3_ref, b3_ref,
                o_ref):
    """One grid step = B_INST independent MLP evaluations, fully in VMEM."""
    b_inst, batch, in_dim = x_ref.shape
    rows = b_inst * batch
    h = x_ref[...].astype(jnp.float32).reshape(rows, in_dim)

    def hidden_block(h, w_ref, g_ref, be_ref):
        # Linear WITHOUT bias: a pre-BatchNorm bias is exactly cancelled by the
        # per-instance batch-mean subtraction (training-mode BatchNorm1d).
        z = jnp.dot(h, w_ref[...], preferred_element_type=jnp.float32)
        hid = z.shape[-1]
        z3 = z.reshape(b_inst, batch, hid)
        # Per-instance BN statistics; two-pass (z - mu)^2 variance (robust).
        mu = jnp.mean(z3, axis=1, keepdims=True)           # (b_inst, 1, hid)
        d = z3 - mu
        var = jnp.mean(d * d, axis=1, keepdims=True)       # biased (train mode)
        scale = g_ref[...] * jax.lax.rsqrt(var + EPS)      # gamma folded in
        zn = d * scale + be_ref[...]
        # LeakyReLU(0.8); Dropout(p=0) is the identity.
        zn = jnp.where(zn >= 0, zn, NEG_SLOPE * zn)
        return zn.reshape(rows, hid)

    h = hidden_block(h, w1_ref, g1_ref, be1_ref)
    h = hidden_block(h, w2_ref, g2_ref, be2_ref)
    # Output Linear(hidden -> 1), emitted directly as a lane-dense (1, rows)
    # row: contract w3_row (1,hidden) with h (rows,hidden) over the hidden axis
    # (trans-B matmul) so the final store is an unmasked full-lane write.
    y = jax.lax.dot_general(w3_ref[...], h, (((1,), (1,)), ((), ())),
                            preferred_element_type=jnp.float32)  # (1, rows)
    o_ref[0] = (y + b3_ref[...]).astype(o_ref.dtype)


def my_mlp_forward(x, params):
    """x: (n_inst, batch, input_dim) or (batch, input_dim).
    params: (w1, b1, g1, be1, w2, b2, g2, be2, w3, b3) with weights as (in, out)."""
    squeeze = (x.ndim == 2)
    if squeeze:
        x = x[None]
    n_inst, batch, in_dim = x.shape

    (w1, _b1, g1, be1, w2, _b2, g2, be2, w3, b3) = params
    h1, h2 = w1.shape[1], w2.shape[1]
    hidden = w3.shape[0]
    w3_row = w3.reshape(1, hidden)
    # b1/b2 intentionally not passed into the kernel (cancelled by BatchNorm).
    kernel_params = (w1, g1, be1, w2, g2, be2, w3_row, b3)

    # --- instance blocking ---------------------------------------------------
    b_inst = max(1, -(-ROWS_TARGET // batch))   # >=128 rows per step (MXU fill)
    b_inst = min(b_inst, n_inst)                # demo-size: collapse to 1 step
    if n_inst * batch >= 2 * ROWS_TARGET:
        # keep >= 2 grid steps when there is enough work for both v7x TCs
        b_inst = min(b_inst, -(-n_inst // 2))
    n_blocks = -(-n_inst // b_inst)
    n_pad = n_blocks * b_inst
    if n_pad != n_inst:
        # zero-padded instances stay finite (var=0 -> rsqrt(eps)) and are
        # sliced off below; they never touch real instances' statistics.
        x = jnp.pad(x, ((0, n_pad - n_inst), (0, 0), (0, 0)))
    rows_blk = b_inst * batch

    def const_spec(a):
        nd = a.ndim
        # Constant index_map: parameter blocks are fetched once, not per step.
        return pl.BlockSpec(a.shape, lambda i, _nd=nd: (0,) * _nd)

    flops = 2 * n_pad * batch * (in_dim * h1 + h1 * h2 + hidden)
    cost = pl.CostEstimate(
        flops=int(flops),
        transcendentals=int(n_pad * (h1 + h2)),            # rsqrt per feature
        bytes_accessed=int(x.size * 4
                           + sum(int(p.size) for p in kernel_params) * 4
                           + n_pad * batch * 4),
    )

    out_shape = jax.ShapeDtypeStruct((n_blocks, 1, rows_blk), jnp.float32)
    out = pl.pallas_call(
        _mlp_kernel,
        out_shape=out_shape,
        grid=(n_blocks,),
        in_specs=[pl.BlockSpec((b_inst, batch, in_dim), lambda i: (i, 0, 0))]
                 + [const_spec(p) for p in kernel_params],
        out_specs=pl.BlockSpec((1, 1, rows_blk), lambda i: (i, 0, 0)),
        compiler_params=pltpu.CompilerParams(
            dimension_semantics=("parallel",)),   # both TCs on v7x
        cost_estimate=cost,
    )(x, *kernel_params)

    out = out.reshape(n_pad, batch)[:n_inst].reshape(n_inst, batch, 1)
    return out[0] if squeeze else out


def _reference_forward(x, params):
    """Pure-JAX reference (keeps the hidden-layer biases to prove equivalence)."""
    (w1, b1, g1, be1, w2, b2, g2, be2, w3, b3) = params

    def block(h, w, b, g, be):
        z = h @ w + b
        mu = jnp.mean(z, axis=0, keepdims=True)
        var = jnp.mean((z - mu) ** 2, axis=0, keepdims=True)
        zn = (z - mu) / jnp.sqrt(var + EPS) * g + be
        return jnp.where(zn >= 0, zn, NEG_SLOPE * zn)

    h = block(x, w1, b1, g1, be1)
    h = block(h, w2, b2, g2, be2)
    return h @ w3 + b3


def make_params(key, input_dim, hidden_dims):
    """Deterministic parameter init (shapes follow MyMLP.__init__)."""
    params = []
    d_in = input_dim
    keys = jax.random.split(key, 3 * len(hidden_dims) + 2)
    ki = iter(range(len(keys)))
    for h in hidden_dims:
        bound = 1.0 / jnp.sqrt(d_in)
        w = jax.random.uniform(keys[next(ki)], (d_in, h), jnp.float32, -bound, bound)
        b = jax.random.uniform(keys[next(ki)], (1, h), jnp.float32, -bound, bound)
        gb = jax.random.normal(keys[next(ki)], (2, h), jnp.float32)
        gamma = 1.0 + 0.1 * gb[0:1]   # BatchNorm weight
        beta = 0.1 * gb[1:2]          # BatchNorm bias
        params += [w, b, gamma, beta]
        d_in = h
    bound = 1.0 / jnp.sqrt(d_in)
    w_out = jax.random.uniform(keys[next(ki)], (d_in, 1), jnp.float32, -bound, bound)
    b_out = jax.random.uniform(keys[next(ki)], (1, 1), jnp.float32, -bound, bound)
    params += [w_out, b_out]
    return tuple(params)


if __name__ == "__main__":
    input_dim = 11          # matches the reference script
    hidden_dims = (32, 32)  # small hidden sizes
    batch = 8
    n_inst = 32             # 32 inst x batch 8 = 256 rows -> 2 blocks of 128 rows

    key = jax.random.PRNGKey(0)
    kx, kp = jax.random.split(key)
    x = jax.random.normal(kx, (n_inst, batch, input_dim), jnp.float32)
    params = make_params(kp, input_dim, hidden_dims)

    out = jax.block_until_ready(my_mlp_forward(x, params))
    ref = jax.vmap(_reference_forward, in_axes=(0, None))(x, params)
    assert out.shape == (n_inst, batch, 1)
    assert jnp.allclose(out, ref, atol=1e-4, rtol=1e-3), float(
        jnp.max(jnp.abs(out - ref)))

    # Exercise the padded path (n_inst not a multiple of the instance block).
    out20 = jax.block_until_ready(my_mlp_forward(x[:20], params))
    assert out20.shape == (20, batch, 1)
    assert jnp.allclose(out20, ref[:20], atol=1e-4, rtol=1e-3)

    # Exercise the single-instance (batch, input_dim) path.
    out1 = jax.block_until_ready(my_mlp_forward(x[0], params))
    assert out1.shape == (batch, 1)
    assert jnp.allclose(out1, ref[0], atol=1e-4, rtol=1e-3)

    print("KERNEL_OK")
</pallas_src>

<mosaic_0001>
module attributes {stable_mosaic.version = 11 : i64} {
  func.func @_mlp_kernel(%arg0: i32, %arg1: memref<16x8x11xf32, #tpu.memory_space<vmem>>, %arg2: memref<11x32xf32, #tpu.memory_space<vmem>>, %arg3: memref<1x32xf32, #tpu.memory_space<vmem>>, %arg4: memref<1x32xf32, #tpu.memory_space<vmem>>, %arg5: memref<32x32xf32, #tpu.memory_space<vmem>>, %arg6: memref<1x32xf32, #tpu.memory_space<vmem>>, %arg7: memref<1x32xf32, #tpu.memory_space<vmem>>, %arg8: memref<1x32xf32, #tpu.memory_space<vmem>>, %arg9: memref<1x1xf32, #tpu.memory_space<vmem>>, %arg10: memref<1x1x128xf32, #tpu.memory_space<vmem>>) attributes {dimension_semantics = [#tpu.dimension_semantics<parallel>], iteration_bounds = array<i64: 2>, scalar_prefetch = 0 : i64, scratch_operands = 0 : i64, tpu.core_type = #tpu.core_type<tc>, window_params = [{transform_indices = @transform_0, window_bounds = array<i64: 16, 8, 11>}, {pipeline_mode = #tpu.pipeline_mode<synchronous>, transform_indices = @transform_1, window_bounds = array<i64: 11, 32>}, {pipeline_mode = #tpu.pipeline_mode<synchronous>, transform_indices = @transform_2, window_bounds = array<i64: 1, 32>}, {pipeline_mode = #tpu.pipeline_mode<synchronous>, transform_indices = @transform_3, window_bounds = array<i64: 1, 32>}, {pipeline_mode = #tpu.pipeline_mode<synchronous>, transform_indices = @transform_4, window_bounds = array<i64: 32, 32>}, {pipeline_mode = #tpu.pipeline_mode<synchronous>, transform_indices = @transform_5, window_bounds = array<i64: 1, 32>}, {pipeline_mode = #tpu.pipeline_mode<synchronous>, transform_indices = @transform_6, window_bounds = array<i64: 1, 32>}, {pipeline_mode = #tpu.pipeline_mode<synchronous>, transform_indices = @transform_7, window_bounds = array<i64: 1, 32>}, {pipeline_mode = #tpu.pipeline_mode<synchronous>, transform_indices = @transform_8, window_bounds = array<i64: 1, 1>}, {transform_indices = @transform_9, window_bounds = array<i64: 1, 1, 128>}]} {
    %c0 = arith.constant 0 : index
    %c0_0 = arith.constant 0 : index
    %c0_1 = arith.constant 0 : index
    %0 = vector.load %arg1[%c0, %c0_0, %c0_1] : memref<16x8x11xf32, #tpu.memory_space<vmem>>, vector<16x8x11xf32>
    %1 = vector.shape_cast %0 : vector<16x8x11xf32> to vector<128x11xf32>
    %c0_2 = arith.constant 0 : index
    %c0_3 = arith.constant 0 : index
    %2 = vector.load %arg2[%c0_2, %c0_3] : memref<11x32xf32, #tpu.memory_space<vmem>>, vector<11x32xf32>
    %cst = arith.constant dense<0.000000e+00> : vector<128x32xf32>
    %3 = tpu.matmul %1, %2, %cst {dimension_numbers = #tpu.dot_dimension_numbers<[1], [0], [0], [1], [0, 0, 1, 1], [], []>} : vector<128x11xf32>, vector<11x32xf32>, vector<128x32xf32> -> vector<128x32xf32>
    %4 = vector.shape_cast %3 : vector<128x32xf32> to vector<16x8x32xf32>
    %cst_4 = arith.constant dense<0.000000e+00> : vector<16x32xf32>
    %5 = vector.multi_reduction <add>, %4, %cst_4 [1] : vector<16x8x32xf32> to vector<16x32xf32>
    %6 = vector.shape_cast %5 : vector<16x32xf32> to vector<16x1x32xf32>
    %cst_5 = arith.constant 8.000000e+00 : f32
    %7 = vector.broadcast %cst_5 : f32 to vector<16x1x32xf32>
    %8 = arith.divf %6, %7 : vector<16x1x32xf32>
    %9 = vector.broadcast %8 : vector<16x1x32xf32> to vector<16x8x32xf32>
    %10 = arith.subf %4, %9 : vector<16x8x32xf32>
    %11 = arith.mulf %10, %10 : vector<16x8x32xf32>
    %cst_6 = arith.constant dense<0.000000e+00> : vector<16x32xf32>
    %12 = vector.multi_reduction <add>, %11, %cst_6 [1] : vector<16x8x32xf32> to vector<16x32xf32>
    %13 = vector.shape_cast %12 : vector<16x32xf32> to vector<16x1x32xf32>
    %cst_7 = arith.constant 8.000000e+00 : f32
    %14 = vector.broadcast %cst_7 : f32 to vector<16x1x32xf32>
    %15 = arith.divf %13, %14 : vector<16x1x32xf32>
    %c0_8 = arith.constant 0 : index
    %c0_9 = arith.constant 0 : index
    %16 = vector.load %arg3[%c0_8, %c0_9] : memref<1x32xf32, #tpu.memory_space<vmem>>, vector<1x32xf32>
    %cst_10 = arith.constant 9.99999974E-6 : f32
    %17 = vector.broadcast %cst_10 : f32 to vector<16x1x32xf32>
    %18 = arith.addf %15, %17 : vector<16x1x32xf32>
    %19 = math.rsqrt %18 : vector<16x1x32xf32>
    %20 = vector.shape_cast %16 : vector<1x32xf32> to vector<1x1x32xf32>
    %21 = vector.broadcast %20 : vector<1x1x32xf32> to vector<16x1x32xf32>
    %22 = arith.mulf %21, %19 : vector<16x1x32xf32>
    %23 = vector.broadcast %22 : vector<16x1x32xf32> to vector<16x8x32xf32>
    %24 = arith.mulf %10, %23 : vector<16x8x32xf32>
    %c0_11 = arith.constant 0 : index
    %c0_12 = arith.constant 0 : index
    %25 = vector.load %arg4[%c0_11, %c0_12] : memref<1x32xf32, #tpu.memory_space<vmem>>, vector<1x32xf32>
    %26 = vector.shape_cast %25 : vector<1x32xf32> to vector<1x1x32xf32>
    %27 = vector.broadcast %26 : vector<1x1x32xf32> to vector<16x8x32xf32>
    %28 = arith.addf %24, %27 : vector<16x8x32xf32>
    %cst_13 = arith.constant 0.000000e+00 : f32
    %29 = vector.broadcast %cst_13 : f32 to vector<16x8x32xf32>
    %30 = arith.cmpf oge, %28, %29 : vector<16x8x32xf32>
    %cst_14 = arith.constant 8.000000e-01 : f32
    %31 = vector.broadcast %cst_14 : f32 to vector<16x8x32xf32>
    %32 = arith.mulf %31, %28 : vector<16x8x32xf32>
    %33 = arith.select %30, %28, %32 : vector<16x8x32xi1>, vector<16x8x32xf32>
    %34 = vector.shape_cast %33 : vector<16x8x32xf32> to vector<128x32xf32>
    %c0_15 = arith.constant 0 : index
    %c0_16 = arith.constant 0 : index
    %35 = vector.load %arg5[%c0_15, %c0_16] : memref<32x32xf32, #tpu.memory_space<vmem>>, vector<32x32xf32>
    %cst_17 = arith.constant dense<0.000000e+00> : vector<128x32xf32>
    %36 = tpu.matmul %34, %35, %cst_17 {dimension_numbers = #tpu.dot_dimension_numbers<[1], [0], [0], [1], [0, 0, 1, 1], [], []>} : vector<128x32xf32>, vector<32x32xf32>, vector<128x32xf32> -> vector<128x32xf32>
    %37 = vector.shape_cast %36 : vector<128x32xf32> to vector<16x8x32xf32>
    %cst_18 = arith.constant dense<0.000000e+00> : vector<16x32xf32>
    %38 = vector.multi_reduction <add>, %37, %cst_18 [1] : vector<16x8x32xf32> to vector<16x32xf32>
    %39 = vector.shape_cast %38 : vector<16x32xf32> to vector<16x1x32xf32>
    %cst_19 = arith.constant 8.000000e+00 : f32
    %40 = vector.broadcast %cst_19 : f32 to vector<16x1x32xf32>
    %41 = arith.divf %39, %40 : vector<16x1x32xf32>
    %42 = vector.broadcast %41 : vector<16x1x32xf32> to vector<16x8x32xf32>
    %43 = arith.subf %37, %42 : vector<16x8x32xf32>
    %44 = arith.mulf %43, %43 : vector<16x8x32xf32>
    %cst_20 = arith.constant dense<0.000000e+00> : vector<16x32xf32>
    %45 = vector.multi_reduction <add>, %44, %cst_20 [1] : vector<16x8x32xf32> to vector<16x32xf32>
    %46 = vector.shape_cast %45 : vector<16x32xf32> to vector<16x1x32xf32>
    %cst_21 = arith.constant 8.000000e+00 : f32
    %47 = vector.broadcast %cst_21 : f32 to vector<16x1x32xf32>
    %48 = arith.divf %46, %47 : vector<16x1x32xf32>
    %c0_22 = arith.constant 0 : index
    %c0_23 = arith.constant 0 : index
    %49 = vector.load %arg6[%c0_22, %c0_23] : memref<1x32xf32, #tpu.memory_space<vmem>>, vector<1x32xf32>
    %cst_24 = arith.constant 9.99999974E-6 : f32
    %50 = vector.broadcast %cst_24 : f32 to vector<16x1x32xf32>
    %51 = arith.addf %48, %50 : vector<16x1x32xf32>
    %52 = math.rsqrt %51 : vector<16x1x32xf32>
    %53 = vector.shape_cast %49 : vector<1x32xf32> to vector<1x1x32xf32>
    %54 = vector.broadcast %53 : vector<1x1x32xf32> to vector<16x1x32xf32>
    %55 = arith.mulf %54, %52 : vector<16x1x32xf32>
    %56 = vector.broadcast %55 : vector<16x1x32xf32> to vector<16x8x32xf32>
    %57 = arith.mulf %43, %56 : vector<16x8x32xf32>
    %c0_25 = arith.constant 0 : index
    %c0_26 = arith.constant 0 : index
    %58 = vector.load %arg7[%c0_25, %c0_26] : memref<1x32xf32, #tpu.memory_space<vmem>>, vector<1x32xf32>
    %59 = vector.shape_cast %58 : vector<1x32xf32> to vector<1x1x32xf32>
    %60 = vector.broadcast %59 : vector<1x1x32xf32> to vector<16x8x32xf32>
    %61 = arith.addf %57, %60 : vector<16x8x32xf32>
    %cst_27 = arith.constant 0.000000e+00 : f32
    %62 = vector.broadcast %cst_27 : f32 to vector<16x8x32xf32>
    %63 = arith.cmpf oge, %61, %62 : vector<16x8x32xf32>
    %cst_28 = arith.constant 8.000000e-01 : f32
    %64 = vector.broadcast %cst_28 : f32 to vector<16x8x32xf32>
    %65 = arith.mulf %64, %61 : vector<16x8x32xf32>
    %66 = arith.select %63, %61, %65 : vector<16x8x32xi1>, vector<16x8x32xf32>
    %67 = vector.shape_cast %66 : vector<16x8x32xf32> to vector<128x32xf32>
    %c0_29 = arith.constant 0 : index
    %c0_30 = arith.constant 0 : index
    %68 = vector.load %arg8[%c0_29, %c0_30] : memref<1x32xf32, #tpu.memory_space<vmem>>, vector<1x32xf32>
    %cst_31 = arith.constant dense<0.000000e+00> : vector<1x128xf32>
    %69 = tpu.matmul %68, %67, %cst_31 {dimension_numbers = #tpu.dot_dimension_numbers<[1], [1], [0], [0], [0, 0, 1, 0], [], []>} : vector<1x32xf32>, vector<128x32xf32>, vector<1x128xf32> -> vector<1x128xf32>
    %c0_32 = arith.constant 0 : index
    %c0_33 = arith.constant 0 : index
    %70 = vector.load %arg9[%c0_32, %c0_33] : memref<1x1xf32, #tpu.memory_space<vmem>>, vector<1x1xf32>
    %71 = vector.broadcast %70 : vector<1x1xf32> to vector<1x128xf32>
    %72 = arith.addf %69, %71 : vector<1x128xf32>
    %c0_34 = arith.constant 0 : index
    %c0_35 = arith.constant 0 : index
    %c0_36 = arith.constant 0 : index
    %73 = vector.load %arg10[%c0_34, %c0_35, %c0_36] : memref<1x1x128xf32, #tpu.memory_space<vmem>>, vector<1x1x128xf32>
    %74 = vector.shape_cast %73 : vector<1x1x128xf32> to vector<1x128xf32>
    %75 = vector.shape_cast %72 : vector<1x128xf32> to vector<1x1x128xf32>
    tpu.vector_store %arg10[%c0_34, %c0_35, %c0_36], %75 {strides = array<i32>} : memref<1x1x128xf32, #tpu.memory_space<vmem>>, vector<1x1x128xf32>,
    return
  }
  func.func @transform_0(%arg0: i32) -> (i32, i32, i32) {
    %c0_i32 = arith.constant 0 : i32
    %c0_i32_0 = arith.constant 0 : i32
    %c0_i32_1 = arith.constant 0 : i32
    return %arg0, %c0_i32, %c0_i32_0 : i32, i32, i32
  }
  func.func @transform_1(%arg0: i32) -> (i32, i32) {
    %c0_i32 = arith.constant 0 : i32
    %c0_i32_0 = arith.constant 0 : i32
    %c0_i32_1 = arith.constant 0 : i32
    return %c0_i32, %c0_i32_0 : i32, i32
  }
  func.func @transform_2(%arg0: i32) -> (i32, i32) {
    %c0_i32 = arith.constant 0 : i32
    %c0_i32_0 = arith.constant 0 : i32
    %c0_i32_1 = arith.constant 0 : i32
    return %c0_i32, %c0_i32_0 : i32, i32
  }
  func.func @transform_3(%arg0: i32) -> (i32, i32) {
    %c0_i32 = arith.constant 0 : i32
    %c0_i32_0 = arith.constant 0 : i32
    %c0_i32_1 = arith.constant 0 : i32
    return %c0_i32, %c0_i32_0 : i32, i32
  }
  func.func @transform_4(%arg0: i32) -> (i32, i32) {
    %c0_i32 = arith.constant 0 : i32
    %c0_i32_0 = arith.constant 0 : i32
    %c0_i32_1 = arith.constant 0 : i32
    return %c0_i32, %c0_i32_0 : i32, i32
  }
  func.func @transform_5(%arg0: i32) -> (i32, i32) {
    %c0_i32 = arith.constant 0 : i32
    %c0_i32_0 = arith.constant 0 : i32
    %c0_i32_1 = arith.constant 0 : i32
    return %c0_i32, %c0_i32_0 : i32, i32
  }
  func.func @transform_6(%arg0: i32) -> (i32, i32) {
    %c0_i32 = arith.constant 0 : i32
    %c0_i32_0 = arith.constant 0 : i32
    %c0_i32_1 = arith.constant 0 : i32
    return %c0_i32, %c0_i32_0 : i32, i32
  }
  func.func @transform_7(%arg0: i32) -> (i32, i32) {
    %c0_i32 = arith.constant 0 : i32
    %c0_i32_0 = arith.constant 0 : i32
    %c0_i32_1 = arith.constant 0 : i32
    return %c0_i32, %c0_i32_0 : i32, i32
  }
  func.func @transform_8(%arg0: i32) -> (i32, i32) {
    %c0_i32 = arith.constant 0 : i32
    %c0_i32_0 = arith.constant 0 : i32
    %c0_i32_1 = arith.constant 0 : i32
    return %c0_i32, %c0_i32_0 : i32, i32
  }
  func.func @transform_9(%arg0: i32) -> (i32, i32, i32) {
    %c0_i32 = arith.constant 0 : i32
    %c0_i32_0 = arith.constant 0 : i32
    %c0_i32_1 = arith.constant 0 : i32
    return %arg0, %c0_i32, %c0_i32_0 : i32, i32, i32
  }
}

</mosaic_0001>

<bundles_post_ra>
// kernel: tpu_custom_call.1
= control target key start
LH: loop header
LB: loop body
LE: loop exit
PB: predicated region body
PF: predicated region fallthrough
CT: control target
= control target key end

     0   :  { %s3258_s0 = inlined_call_operand.vmem [shape: f32[32,8,11], index: 0, kind: input, shape index: {}]   ;;  %s3259_s1 = inlined_call_operand.vmem [shape: f32[11,32], index: 1, kind: input, shape index: {}]   ;;  %s3260_s2 = inlined_call_operand.vmem [shape: f32[1,32], index: 2, kind: input, shape index: {}]   ;;  %s3261_s3 = inlined_call_operand.vmem [shape: f32[1,32], index: 3, kind: input, shape index: {}]   ;;  %s3262_s4 = inlined_call_operand.vmem [shape: f32[32,32], index: 4, kind: input, shape index: {}]   ;;  %s3263_s5 = inlined_call_operand.vmem [shape: f32[1,32], index: 5, kind: input, shape index: {}]   ;;  %s3264_s6 = inlined_call_operand.vmem [shape: f32[1,32], index: 6, kind: input, shape index: {}]   ;;  %s3265_s7 = inlined_call_operand.vmem [shape: f32[1,32], index: 7, kind: input, shape index: {}]   ;;  %s3266_s8 = inlined_call_operand.<no memory space> [shape: f32[1,1], index: 8, kind: input, shape index: {}]   ;;  %s3267_s9 = inlined_call_operand.hbm [shape: f32[2,1,128], index: 9, kind: output, shape index: {}]  }
   0x1   :  { %v14_v0 = vstv %s3266_s8 }
   0x2   :  { %15 = vst [vmem:[#allocation2] sm:$0x1] %v14_v0 }
   0x3   :  { %16 = vsyncpa [#allocation4], 0 }
   0x4   :  { %18 = vsyncpa [#allocation4 + $0x1], 0  ;;  %s2479_s11 = smov 0   ;;  %s2481_s12 = smov 0  }
   0x5   :  { %s2483_s13 = smov 0   ;;  %s2485_s14 = smov 0  }
   0x6 LB: > { %s1989_s8 = sadd.s32 4294967295, %s2418_s14   ;;  %s1990_s15 = sadd.s32 4294967294, %s2418_s14   ;;  %s2418_s14 = sphi %s2485_s14, %s3275_s14   ;;  %s2414_s13 = sphi %s2483_s13, %s3274_s13   ;;  %s2410_s12 = sphi %s2481_s12, %s3273_s12   ;;  %s2406_s11 = sphi %s2479_s11, %s3272_s11  }
   0x7   : > { %s2502_s16 = sadd.s32 1, %s2418_s14   ;;  %s225_s17 = sadd.s32 1, %s2414_s13 }
   0x8   : > { %s222_s18 = ssub.s32 %s2418_s14, %s2502_s16  ;;  %p235_p0 = scmp.ne.s32.totalorder %s2414_s13, %s2410_s12 }
   0x9   : > { %p223_p1 = scmp.eq.s32.totalorder %s222_s18, 0  ;;  %p236_p2 = scmp.eq.s32.totalorder %s1989_s8, 1 }
   0xa   : > { %p241_p3 = scmp.ne.s32.totalorder %s2410_s12, %s2406_s11  ;;  %p242_p4 = scmp.eq.s32.totalorder %s1990_s15, 1 }
   0xb   : > { %s2512_s19 = scalar_select %p223_p1, %s2414_s13, %s225_s17  }
   0xc   : > { %p2514_p5 = por %p236_p2, %p235_p0  ;;  %p2518_p6 = por %p242_p4, %p241_p3 }
   0xd   : > { %p1993_p7 = scmp.ge.s32.totalorder %s2418_s14, 1  ;;  %p293_p8 = scmp.lt.s32.totalorder %s2418_s14, 3 }
   0xf   : > { %p294_p9 = pnand %p1993_p7, %p293_p8 }
  0x10   : > { %v350_v1 = vld [vmem:[%s3259_s1] sm:$0xff] (!%p294_p9)  ;;  %v351_v2 = vld [vmem:[%s3259_s1 + $0x8] sm:$0x7] (!%p294_p9)  ;;  %vm401_vm0 = vcmask (!%p294_p9), 1042432   ;;  %s2530_s26 = sshll.u32 (!%p294_p9), %s1989_s8, 4  ;;  %vm2420_vm1 = vmmov (!%p294_p9), 1   ;;  %v905_v33 = vlaneseq (!%p294_p9) }
  0x11   : > { %297 = sbr.rel (%p294_p9) target bundleno = 917 (0x395), region = 56  ;;  %v2201_v3 = vpack.c.bf16 (!%p294_p9), %v351_v2, %v350_v1  ;;  %vm2202_vm2 = vmpackc.low (!%p294_p9), %vm401_vm0, %vm2420_vm1  ;;  %p329_p10 = scmp.lt.s32.totalorder (!%p294_p9), %s2530_s26, 31  ;;  %vm352_vm3 = vcmask (!%p294_p9), 89088   ;;  %v1072_v20 = vld [vmem:[%s3262_s4] sm:$0xff] (!%p294_p9)  ;;  %v1073_v21 = vld [vmem:[%s3262_s4 + $0x8] sm:$0xff] (!%p294_p9)  ;;  %vm550_vm4 = vcmask (!%p294_p9), 261120  }
  0x12   : > { %v2207_v22 = vpack.c.bf16 (!%p294_p9), %v1073_v21, %v1072_v20  ;;  %v1074_v23 = vld [vmem:[%s3262_s4 + $0x10] sm:$0xff] (!%p294_p9)  ;;  %v1075_v24 = vld [vmem:[%s3262_s4 + $0x18] sm:$0xff] (!%p294_p9)  ;;  %v906_v44 = vshrl.u32 (!%p294_p9), %v905_v33, 7  ;;  %s326_s23 = sand.u32 (!%p294_p9), 1, %s2410_s12   ;;  %s3216_s29 = scalar_lea.hbm (!%p294_p9), %s3267_s9, %s2530_s26 }
  0x13   : > { %2203 = vmatprep.subr.msk.bf16.mxu1 (!%p294_p9), %vm2202_vm2, %v2201_v3  ;;  %v2211_v25 = vpack.c.bf16 (!%p294_p9), %v1075_v24, %v1074_v23  ;;  %s327_s24 = scalar_lea.vmem (!%p294_p9), [#allocation3], %s326_s23  ;;  %s1923_s30 = scalar_lea.sflag (!%p294_p9), [#allocation4], %s326_s23 }
  0x14   : > { %2206 = vmatpush3.bf16.msk.msra.mxu1 (!%p294_p9), %vm2202_vm2, %v2201_v3  ;;  %v2598_v59 = vsub.s32 (!%p294_p9), 0, %v906_v44  ;;  %s1935_s25 = sshll.u32 (!%p294_p9), %s327_s24, 4  ;;  %s2425_s8 = smov (!%p294_p9), [#allocation3]   ;;  %s3218_s25 = int_to_ptr.vmem [resolvable:$true] %s1935_s25 }
  0x15   : > { %2208 = vmatprep.subr.bf16.mxu1 (!%p294_p9), %v2207_v22  ;;  %s2360_s15 = sshll.u32 (!%p294_p9), %s2425_s8, 4  ;;  %s2361_s15 = int_to_ptr.vmem [resolvable:$false] %s2360_s15 }
  0x16   : > { %s2362_s17 = scalar_lea.vmem (!%p294_p9), %s2361_s15, 32  ;;  %p2363_p0 = scmp.lt.s32.totalorder (!%p294_p9), %s3218_s25, %s2361_s15 }
  0x18   : > { %s330_s27 = scalar_select %p329_p10, %s2530_s26, 31 }
  0x1a   : > { %s1995_s28 = sshll.u32 %s330_s27, 3 }
  0x1b   : > { %s2537_s10 = scalar_lea.vmem %s3258_s0, %s1995_s28 }
  0x1c   : > { %v334_v4 = vld [vmem:[%s2537_s10] sm:$0xff]  ;;  %v335_v5 = vld [vmem:[%s2537_s10 + $0x8] sm:$0xff]  ;;  %v336_v6 = vld [vmem:[%s2537_s10 + $0x10] sm:$0xff] }
  0x1d   : > { %2110 = vmatprep.mubr.msk.f32.mxu1 %vm352_vm3, %v334_v4  ;;  %v337_v7 = vld [vmem:[%s2537_s10 + $0x18] sm:$0xff]  ;;  %v338_v8 = vld [vmem:[%s2537_s10 + $0x20] sm:$0xff]  ;;  %v339_v9 = vld [vmem:[%s2537_s10 + $0x28] sm:$0xff] }
  0x1e   : > { %2111 = vmatmul.mubr.msk.f32.vlgmr.msra.gmra.mrb[0].mxu1 %vm352_vm3, %v335_v5  ;;  %v340_v10 = vld [vmem:[%s2537_s10 + $0x30] sm:$0xff]  ;;  %v341_v11 = vld [vmem:[%s2537_s10 + $0x38] sm:$0xff]  ;;  %v342_v12 = vld [vmem:[%s2537_s10 + $0x40] sm:$0xff] }
  0x1f   : > { %2113 = vmatprep.mubr.msk.f32.mxu1 %vm352_vm3, %v336_v6  ;;  %v343_v13 = vld [vmem:[%s2537_s10 + $0x48] sm:$0xff]  ;;  %v344_v14 = vld [vmem:[%s2537_s10 + $0x50] sm:$0xff]  ;;  %v345_v15 = vld [vmem:[%s2537_s10 + $0x58] sm:$0xff]  ;;  %2210 = vmatpush3.bf16.msra.mxu1 %v2207_v22 }
  0x20   : > { %v346_v16 = vld [vmem:[%s2537_s10 + $0x60] sm:$0xff]  ;;  %v347_v17 = vld [vmem:[%s2537_s10 + $0x68] sm:$0xff]  ;;  %v348_v18 = vld [vmem:[%s2537_s10 + $0x70] sm:$0xff]  ;;  %2212 = vmatprep.subr.bf16.mxu1 %v2211_v25 }
  0x21   : > { %v349_v19 = vld [vmem:[%s2537_s10 + $0x78] sm:$0xff]  ;;  %s2356_s10 = scalar_lea.vmem %s3218_s25, 16 }
  0x22   : > { %2114 = vmatmul.mubr.msk.f32.gmra.mrb[2].mxu1 %vm352_vm3, %v337_v7  ;;  %p2357_p11 = scmp.ne.s32.totalorder %s3218_s25, %s2356_s10  ;;  %p2364_p1 = scmp.lt.s32.totalorder %s2362_s17, %s2356_s10 }
  0x23   : > { %2116 = vmatprep.mubr.msk.f32.mxu1 %vm352_vm3, %v338_v8  ;;  %2214 = vmatpush3.bf16.msra.mxu1 %v2211_v25 }
  0x24   : > { %p2358_p12 = pnand %p2357_p11, %p2514_p5  ;;  %p2365_p2 = por %p2364_p1, %p2363_p0 }
  0x26   : > { %2117 = vmatmul.mubr.msk.f32.gmra.mrb[4].mxu1 %vm352_vm3, %v339_v9  ;;  %p2359_p13 = pneg %p2358_p12 }
  0x27   : > { %2119 = vmatprep.mubr.msk.f32.mxu1 %vm352_vm3, %v340_v10 }
  0x28   : > { %p2366_p3 = pnand %p2365_p2, %p2359_p13 }
  0x2a   : > { %2120 = vmatmul.mubr.msk.f32.gmra.mrb[6].mxu1 %vm352_vm3, %v341_v11 }
  0x2b   : > { %2122 = vmatprep.mubr.msk.f32.mxu1 %vm352_vm3, %v342_v12 }
  0x2e   : > { %2123 = vmatmul.mubr.msk.f32.gmra.mrb[8].mxu1 %vm352_vm3, %v343_v13 }
  0x2f   : > { %2125 = vmatprep.mubr.msk.f32.mxu1 %vm352_vm3, %v344_v14 }
  0x32   : > { %2126 = vmatmul.mubr.msk.f32.gmra.mrb[10].mxu1 %vm352_vm3, %v345_v15 }
  0x33   : > { %2128 = vmatprep.mubr.msk.f32.mxu1 %vm352_vm3, %v346_v16 }
  0x36   : > { %2129 = vmatmul.mubr.msk.f32.gmra.mrb[12].mxu1 %vm352_vm3, %v347_v17 }
  0x37   : > { %2131 = vmatprep.mubr.msk.f32.mxu1 %vm352_vm3, %v348_v18 }
  0x3a   : > { %2132 = vmatmul.mubr.msk.f32.gmra.mrb[14].mxu1 %vm352_vm3, %v349_v19 }
  0xf1   : > { %v2112_v26 = vpop.f32.mrb[0].mxu1 }
  0xf2   : > { %v558_v27 = vsel %vm550_vm4, %v2112_v26, 0.0  ;;  %v471_v28 = vpop.f32.mrb[1].mxu1 }
  0xf3   : > { %v559_v29 = vrot.slane %v558_v27, 4  ;;  %v551_v30 = vsel %vm550_vm4, %v471_v28, 0.0 }
  0xf4   : > { %v552_v31 = vrot.slane %v551_v30, 4 }
  0xf5   : > { %v560_v32 = vadd.f32 %v559_v29, %v558_v27  ;;  %v2115_v34 = vpop.f32.mrb[2].mxu1 }
  0xf6   : > { %v553_v35 = vadd.f32 %v552_v31, %v551_v30  ;;  %v572_v36 = vsel %vm550_vm4, %v2115_v34, 0.0  ;;  %v2586_v37 = vpop.f32.mrb[3].mxu1 }
  0xf7   : > { %v561_v38 = vrot.slane %v560_v32, 2  ;;  %v573_v39 = vrot.slane %v572_v36, 4  ;;  %v565_v40 = vsel %vm550_vm4, %v2586_v37, 0.0 }
  0xf8   : > { %v554_v41 = vrot.slane %v553_v35, 2  ;;  %v566_v42 = vrot.slane %v565_v40, 4 }
  0xf9   : > { %v562_v43 = vadd.f32 %v561_v38, %v560_v32  ;;  %v574_v45 = vadd.f32 %v573_v39, %v572_v36  ;;  %v2590_v46 = vpop.f32.mrb[4].mxu1 }
  0xfa   : > { %v555_v47 = vadd.f32 %v554_v41, %v553_v35  ;;  %v567_v48 = vadd.f32 %v566_v42, %v565_v40  ;;  %v586_v49 = vsel %vm550_vm4, %v2590_v46, 0.0  ;;  %v2594_v50 = vpop.f32.mrb[5].mxu1 }
  0xfb   : > { %v563_v51 = vrot.slane %v562_v43, 1  ;;  %v575_v52 = vrot.slane %v574_v45, 2  ;;  %v587_v53 = vrot.slane %v586_v49, 4  ;;  %v579_v54 = vsel %vm550_vm4, %v2594_v50, 0.0 }
  0xfc   : > { %v556_v55 = vrot.slane %v555_v47, 1  ;;  %v568_v56 = vrot.slane %v567_v48, 2  ;;  %v580_v57 = vrot.slane %v579_v54, 4 }
  0xfd   : > { %v564_v58 = vadd.f32 %v563_v51, %v562_v43  ;;  %v576_v60 = vadd.f32 %v575_v52, %v574_v45  ;;  %v588_v61 = vadd.f32 %v587_v53, %v586_v49  ;;  %v2600_v62 = vpop.f32.mrb[6].mxu1 }
  0xfe   : > { %v557_v63 = vadd.f32 %v556_v55, %v555_v47  ;;  %v569_v0 = vadd.f32 %v568_v56, %v567_v48  ;;  %v581_v1 = vadd.f32 %v580_v57, %v579_v54  ;;  %v600_v2 = vsel %vm550_vm4, %v2600_v62, 0.0  ;;  %v2604_v3 = vpop.f32.mrb[7].mxu1 }
  0xff   : > { %v665_v4 = vmul.f32 0.125, %v564_v58  ;;  %v577_v5 = vrot.slane %v576_v60, 1  ;;  %v589_v6 = vrot.slane %v588_v61, 2  ;;  %v601_v7 = vrot.slane %v600_v2, 4 }
 0x100   : > { %v664_v8 = vmul.f32 0.125, %v557_v63  ;;  %v570_v9 = vrot.slane %v569_v0, 1  ;;  %v582_v10 = vrot.slane %v581_v1, 2  ;;  %v593_v11 = vsel %vm550_vm4, %v2604_v3, 0.0 }
 0x101   : > { %v2608_v12 = vsub.f32 %v2112_v26, %v665_v4  ;;  %v578_v13 = vadd.f32 %v577_v5, %v576_v60  ;;  %v590_v14 = vadd.f32 %v589_v6, %v588_v61  ;;  %v602_v15 = vadd.f32 %v601_v7, %v600_v2  ;;  %v2610_v16 = vpop.f32.mrb[8].mxu1 }
 0x102   : > { %v2612_v17 = vsub.f32 %v471_v28, %v664_v8  ;;  %v571_v18 = vadd.f32 %v570_v9, %v569_v0  ;;  %v583_v19 = vadd.f32 %v582_v10, %v581_v1  ;;  %v594_v20 = vrot.slane %v593_v11, 4  ;;  %v2614_v21 = vpop.f32.mrb[9].mxu1 }
 0x103   : > { %v697_v22 = vmul.f32 %v2608_v12, %v2608_v12  ;;  %v667_v23 = vmul.f32 0.125, %v578_v13  ;;  %v591_v24 = vrot.slane %v590_v14, 1  ;;  %v603_v25 = vrot.slane %v602_v15, 2 }
 0x104   : > { %v696_v26 = vmul.f32 %v2612_v17, %v2612_v17  ;;  %v666_v27 = vmul.f32 0.125, %v571_v18  ;;  %v584_v29 = vrot.slane %v583_v19, 1  ;;  %v595_v30 = vadd.f32 %v594_v20, %v593_v11 }
 0x105   : > { %v719_v28 = vsel %vm550_vm4, %v697_v22, 0.0  ;;  %v2621_v31 = vsub.f32 %v2115_v34, %v667_v23  ;;  %v592_v32 = vadd.f32 %v591_v24, %v590_v14  ;;  %v604_v33 = vadd.f32 %v603_v25, %v602_v15  ;;  %v2623_v35 = vpop.f32.mrb[10].mxu1 }
 0x106   : > { %v720_v36 = vrot.slane %v719_v28, 4  ;;  %v712_v38 = vsel %vm550_vm4, %v696_v26, 0.0  ;;  %v2627_v39 = vsub.f32 %v2586_v37, %v666_v27  ;;  %v585_v40 = vadd.f32 %v584_v29, %v583_v19  ;;  %v2629_v41 = vpop.f32.mrb[11].mxu1 }
 0x107   : > { %v713_v42 = vrot.slane %v712_v38, 4  ;;  %v699_v43 = vmul.f32 %v2621_v31, %v2621_v31  ;;  %v669_v44 = vmul.f32 0.125, %v592_v32  ;;  %v605_v34 = vrot.slane %v604_v33, 1 }
 0x108   : > { %v721_v45 = vadd.f32 %v720_v36, %v719_v28  ;;  %v698_v47 = vmul.f32 %v2627_v39, %v2627_v39  ;;  %v668_v48 = vmul.f32 0.125, %v585_v40  ;;  %v596_v49 = vrot.slane %v595_v30, 2 }
 0x109   : > { %v714_v51 = vadd.f32 %v713_v42, %v712_v38  ;;  %v733_v52 = vsel %vm550_vm4, %v699_v43, 0.0  ;;  %v2637_v37 = vsub.f32 %v2590_v46, %v669_v44  ;;  %v606_v53 = vadd.f32 %v605_v34, %v604_v33  ;;  %v2639_v54 = vpop.f32.mrb[12].mxu1 }
 0x10a   : > { %v722_v55 = vrot.slane %v721_v45, 2  ;;  %v734_v56 = vrot.slane %v733_v52, 4  ;;  %v726_v57 = vsel %vm550_vm4, %v698_v47, 0.0  ;;  %v2643_v58 = vsub.f32 %v2594_v50, %v668_v48  ;;  %v2645_v60 = vpop.f32.mrb[13].mxu1 }
 0x10b   : > { %v715_v61 = vrot.slane %v714_v51, 2  ;;  %v727_v63 = vrot.slane %v726_v57, 4  ;;  %v701_v0 = vmul.f32 %v2637_v37, %v2637_v37  ;;  %v671_v1 = vmul.f32 0.125, %v606_v53 }
 0x10c   : > { %v723_v46 = vadd.f32 %v722_v55, %v721_v45  ;;  %v735_v2 = vadd.f32 %v734_v56, %v733_v52  ;;  %v700_v4 = vmul.f32 %v2643_v58, %v2643_v58  ;;  %v597_v5 = vadd.f32 %v596_v49, %v595_v30 }
 0x10d   : > { %v716_v6 = vadd.f32 %v715_v61, %v714_v51  ;;  %v728_v7 = vadd.f32 %v727_v63, %v726_v57  ;;  %v747_v8 = vsel %vm550_vm4, %v701_v0, 0.0  ;;  %v2653_v50 = vsub.f32 %v2600_v62, %v671_v1  ;;  %v2655_v9 = vpop.f32.mrb[14].mxu1 }
 0x10e   : > { %v724_v10 = vrot.slane %v723_v46, 1  ;;  %v736_v11 = vrot.slane %v735_v2, 2  ;;  %v748_v13 = vrot.slane %v747_v8, 4  ;;  %v740_v14 = vsel %vm550_vm4, %v700_v4, 0.0  ;;  %v2658_v15 = vpop.f32.mrb[15].mxu1 }
 0x10f   : > { %v717_v18 = vrot.slane %v716_v6, 1  ;;  %v729_v19 = vrot.slane %v728_v7, 2  ;;  %v741_v20 = vrot.slane %v740_v14, 4  ;;  %v703_v22 = vmul.f32 %v2653_v50, %v2653_v50 }
 0x110   : > { %v725_v23 = vadd.f32 %v724_v10, %v723_v46  ;;  %v737_v24 = vadd.f32 %v736_v11, %v735_v2  ;;  %v749_v25 = vadd.f32 %v748_v13, %v747_v8  ;;  %v598_v62 = vrot.slane %v597_v5, 1 }
 0x111   : > { %v718_v26 = vadd.f32 %v717_v18, %v716_v6  ;;  %v730_v27 = vadd.f32 %v729_v19, %v728_v7  ;;  %v742_v29 = vadd.f32 %v741_v20, %v740_v14  ;;  %v761_v30 = vsel %vm550_vm4, %v703_v22, 0.0 }
 0x112   : > { %v825_v28 = vmul.f32 0.125, %v725_v23  ;;  %v738_v32 = vrot.slane %v737_v24, 1  ;;  %v750_v33 = vrot.slane %v749_v25, 2  ;;  %v762_v36 = vrot.slane %v761_v30, 4 }
 0x113   : > { %v824_v38 = vmul.f32 0.125, %v718_v26  ;;  %v731_v40 = vrot.slane %v730_v27, 1  ;;  %v743_v42 = vrot.slane %v742_v29, 2  ;;  %v599_v43 = vadd.f32 %v598_v62, %v597_v5  ;;  %v2680_v26 = vld [vmem:[%s3260_s2] sm:$0x1] }
 0x114   : > { %v842_v44 = vadd.f32 1e-05, %v825_v28  ;;  %v739_v34 = vadd.f32 %v738_v32, %v737_v24  ;;  %v751_v45 = vadd.f32 %v750_v33, %v749_v25  ;;  %v763_v47 = vadd.f32 %v762_v36, %v761_v30 }
 0x115   : > { %v841_v48 = vadd.f32 1e-05, %v824_v38  ;;  %v732_v49 = vadd.f32 %v731_v40, %v730_v27  ;;  %v744_v51 = vadd.f32 %v743_v42, %v742_v29  ;;  %v670_v52 = vmul.f32 0.125, %v599_v43 }
 0x116   : > { %2292 = vrsqrt.f32 %v842_v44  ;;  %v827_v53 = vmul.f32 0.125, %v739_v34  ;;  %v752_v55 = vrot.slane %v751_v45, 1  ;;  %v764_v56 = vrot.slane %v763_v47, 2 }
 0x117   : > { %2294 = vrsqrt.f32 %v841_v48  ;;  %v826_v57 = vmul.f32 0.125, %v732_v49  ;;  %v745_v61 = vrot.slane %v744_v51, 1  ;;  %v2664_v63 = vsub.f32 %v2604_v3, %v670_v52 }
 0x118   : > { %v844_v0 = vadd.f32 1e-05, %v827_v53  ;;  %v753_v1 = vadd.f32 %v752_v55, %v751_v45  ;;  %v765_v46 = vadd.f32 %v764_v56, %v763_v47  ;;  %v614_v2 = vsel %vm550_vm4, %v2610_v16, 0.0 }
 0x119   : > { %v843_v4 = vadd.f32 1e-05, %v826_v57  ;;  %v746_v5 = vadd.f32 %v745_v61, %v744_v51  ;;  %v702_v6 = vmul.f32 %v2664_v63, %v2664_v63  ;;  %v615_v7 = vrot.slane %v614_v2, 4  ;;  %v2690_v61 = vld [vmem:[%s3261_s3] ss:$0 sm:$0xff] }
 0x11a   : > { %2296 = vrsqrt.f32 %v844_v0  ;;  %v829_v8 = vmul.f32 0.125, %v753_v1  ;;  %v766_v10 = vrot.slane %v765_v46, 1  ;;  %v607_v11 = vsel %vm550_vm4, %v2614_v21, 0.0 }
 0x11b   : > { %2298 = vrsqrt.f32 %v843_v4  ;;  %v828_v3 = vmul.f32 0.125, %v746_v5  ;;  %v754_v13 = vsel %vm550_vm4, %v702_v6, 0.0  ;;  %v616_v14 = vadd.f32 %v615_v7, %v614_v2 }
 0x11c   : > { %v846_v18 = vadd.f32 1e-05, %v829_v8  ;;  %v767_v19 = vadd.f32 %v766_v10, %v765_v46  ;;  %v755_v20 = vrot.slane %v754_v13, 4  ;;  %v608_v22 = vrot.slane %v607_v11, 4 }
 0x11d   : > { %v845_v23 = vadd.f32 1e-05, %v828_v3  ;;  %v617_v24 = vrot.slane %v616_v14, 2  ;;  %v628_v25 = vsel %vm550_vm4, %v2623_v35, 0.0  ;;  %v621_v62 = vsel %vm550_vm4, %v2629_v41, 0.0 }
 0x11e   : > { %2300 = vrsqrt.f32 %v846_v18  ;;  %v831_v27 = vmul.f32 0.125, %v767_v19  ;;  %v756_v29 = vadd.f32 %v755_v20, %v754_v13  ;;  %v609_v30 = vadd.f32 %v608_v22, %v607_v11 }
 0x11f   : > { %2302 = vrsqrt.f32 %v845_v23  ;;  %v618_v28 = vadd.f32 %v617_v24, %v616_v14  ;;  %v629_v32 = vrot.slane %v628_v25, 4  ;;  %v622_v33 = vrot.slane %v621_v62, 4 }
 0x120   : > { %v2293_v36 = vpop.eup %2292  ;;  %v848_v38 = vadd.f32 1e-05, %v831_v27  ;;  %v757_v40 = vrot.slane %v756_v29, 2  ;;  %v610_v42 = vrot.slane %v609_v30, 2  ;;  %v642_v56 = vsel %vm550_vm4, %v2639_v54, 0.0 }
 0x121   : > { %v2295_v43 = vpop.eup %2294  ;;  %v874_v44 = vmul.f32 %v2293_v36, %v2680_v26  ;;  %v619_v34 = vrot.slane %v618_v28, 1  ;;  %v630_v45 = vadd.f32 %v629_v32, %v628_v25  ;;  %v623_v47 = vadd.f32 %v622_v33, %v621_v62 }
 0x122   : > { %v873_v48 = vmul.f32 %v2295_v43, %v2680_v26  ;;  %2304 = vrsqrt.f32 %v848_v38  ;;  %v758_v49 = vadd.f32 %v757_v40, %v756_v29  ;;  %v611_v51 = vadd.f32 %v610_v42, %v609_v30 }
 0x123   : > { %v912_v52 = vrot.slane %v874_v44, %v2598_v59  ;;  %v620_v53 = vadd.f32 %v619_v34, %v618_v28  ;;  %v631_v55 = vrot.slane %v630_v45, 2  ;;  %v624_v2 = vrot.slane %v623_v47, 2 }
 0x124   : > { %v2297_v57 = vpop.eup %2296  ;;  %v908_v0 = vrot.slane %v873_v48, %v2598_v59  ;;  %v759_v1 = vrot.slane %v758_v49, 1  ;;  %v612_v46 = vrot.slane %v611_v51, 1  ;;  %v643_v25 = vrot.slane %v642_v56, 4 }
 0x125   : > { %v2299_v4 = vpop.eup %2298  ;;  %v986_v5 = vmul.f32 %v912_v52, %v2608_v12  ;;  %v876_v6 = vmul.f32 %v2297_v57, %v2680_v26  ;;  %v673_v7 = vmul.f32 0.125, %v620_v53  ;;  %v632_v8 = vadd.f32 %v631_v55, %v630_v45 }
 0x126   : > { %v985_v10 = vmul.f32 %v908_v0, %v2612_v17  ;;  %v875_v11 = vmul.f32 %v2299_v4, %v2680_v26  ;;  %v760_v3 = vadd.f32 %v759_v1, %v758_v49  ;;  %v613_v13 = vadd.f32 %v612_v46, %v611_v51 }
 0x127   : > { %v2698_v14 = vadd.f32 %v2690_v61, %v986_v5  ;;  %v920_v18 = vrot.slane %v876_v6, %v2598_v59  ;;  %v2702_v19 = vsub.f32 %v2610_v16, %v673_v7  ;;  %v633_v20 = vrot.slane %v632_v8, 1 }
 0x128   : > { %v2301_v12 = vpop.eup %2300  ;;  %v916_v22 = vrot.slane %v875_v11, %v2598_v59  ;;  %v830_v23 = vmul.f32 0.125, %v760_v3  ;;  %v672_v24 = vmul.f32 0.125, %v613_v13  ;;  %v2709_v27 = vadd.f32 %v2690_v61, %v985_v10 }
 0x129   : > { %v2303_v17 = vpop.eup %2302  ;;  %v2706_v62 = vmul.f32 0.8, %v2698_v14  ;;  %v988_v29 = vmul.f32 %v920_v18, %v2621_v31  ;;  %v878_v30 = vmul.f32 %v2301_v12, %v2680_v26  ;;  %v705_v33 = vmul.f32 %v2702_v19, %v2702_v19 }
 0x12a   : > { %v987_v16 = vmul.f32 %v916_v22, %v2627_v39  ;;  %v877_v28 = vmul.f32 %v2303_v17, %v2680_v26  ;;  %v847_v32 = vadd.f32 1e-05, %v830_v23  ;;  %v2722_v40 = vsub.f32 %v2614_v21, %v672_v24 }
 0x12b   : > { %v2718_v36 = vadd.f32 %v2690_v61, %v988_v29  ;;  %v928_v38 = vrot.slane %v878_v30, %v2598_v59  ;;  %v634_v42 = vadd.f32 %v633_v20, %v632_v8  ;;  %v775_v44 = vsel %vm550_vm4, %v705_v33, 0.0 }
 0x12c   : > { %v2305_v31 = vpop.eup %2304  ;;  %v2725_v43 = vadd.f32 %v2690_v61, %v987_v16  ;;  %v924_v39 = vrot.slane %v877_v28, %v2598_v59  ;;  %2306 = vrsqrt.f32 %v847_v32  ;;  %v776_v48 = vrot.slane %v775_v44, 4 }
 0x12d   : > { %v990_v34 = vmul.f32 %v928_v38, %v2637_v37  ;;  %v880_v45 = vmul.f32 %v2305_v31, %v2680_v26  ;;  %v704_v49 = vmul.f32 %v2722_v40, %v2722_v40  ;;  %v675_v51 = vmul.f32 0.125, %v634_v42 }
 0x12e   : > { %v989_v21 = vmul.f32 %v924_v39, %v2643_v58  ;;  %v625_v52 = vadd.f32 %v624_v2, %v623_v47  ;;  %v644_v53 = vadd.f32 %v643_v25, %v642_v56  ;;  %v777_v0 = vadd.f32 %v776_v48, %v775_v44 }
 0x12f   : > { %v2735_v55 = vadd.f32 %v2690_v61, %v990_v34  ;;  %v936_v57 = vrot.slane %v880_v45, %v2598_v59  ;;  %v768_v1 = vsel %vm550_vm4, %v704_v49, 0.0  ;;  %v2743_v4 = vsub.f32 %v2623_v35, %v675_v51 }
 0x130   : > { %v2740_v37 = vadd.f32 %v2690_v61, %v989_v21  ;;  %v769_v46 = vrot.slane %v768_v1, 4  ;;  %v626_v5 = vrot.slane %v625_v52, 1  ;;  %v778_v47 = vrot.slane %v777_v0, 2 }
 0x131   : > { %v992_v58 = vmul.f32 %v936_v57, %v2653_v50  ;;  %v645_v56 = vrot.slane %v644_v53, 2  ;;  %v635_v2 = vsel %vm550_vm4, %v2645_v60, 0.0  ;;  %v707_v7 = vmul.f32 %v2743_v4, %v2743_v4 }
 0x132   : > { %v770_v6 = vadd.f32 %v769_v46, %v768_v1  ;;  %v627_v8 = vadd.f32 %v626_v5, %v625_v52  ;;  %v636_v10 = vrot.slane %v635_v2, 4  ;;  %v779_v3 = vadd.f32 %v778_v47, %v777_v0 }
 0x133   : > { %v2751_v11 = vadd.f32 %v2690_v61, %v992_v58  ;;  %v646_v35 = vadd.f32 %v645_v56, %v644_v53  ;;  %v656_v13 = vsel %vm550_vm4, %v2655_v9, 0.0  ;;  %v789_v18 = vsel %vm550_vm4, %v707_v7, 0.0 }
 0x134   : > { %v771_v50 = vrot.slane %v770_v6, 2  ;;  %v674_v20 = vmul.f32 0.125, %v627_v8  ;;  %v637_v12 = vadd.f32 %v636_v10, %v635_v2  ;;  %v780_v22 = vrot.slane %v779_v3, 1 }
 0x135   : > { %v790_v23 = vrot.slane %v789_v18, 4  ;;  %v647_v24 = vrot.slane %v646_v35, 1  ;;  %v657_v25 = vrot.slane %v656_v13, 4  ;;  %v649_v28 = vsel %vm550_vm4, %v2658_v15, 0.0 }
 0x136   : > { %v2307_v17 = vpop.eup %2306  ;;  %v772_v29 = vadd.f32 %v771_v50, %v770_v6  ;;  %v2757_v30 = vsub.f32 %v2629_v41, %v674_v20  ;;  %v638_v16 = vrot.slane %v637_v12, 2  ;;  %vm1025_vm5 = vcmp.ge.f32.partialorder %v2698_v14, 0.0 }
 0x137   : > { %v879_v32 = vmul.f32 %v2307_v17, %v2680_v26  ;;  %v781_v33 = vadd.f32 %v780_v22, %v779_v3  ;;  %v791_v38 = vadd.f32 %v790_v23, %v789_v18  ;;  %v648_v42 = vadd.f32 %v647_v24, %v646_v35 }
 0x138   : > { %v773_v31 = vrot.slane %v772_v29, 1  ;;  %v706_v39 = vmul.f32 %v2757_v30, %v2757_v30  ;;  %v639_v44 = vadd.f32 %v638_v16, %v637_v12  ;;  %v658_v34 = vadd.f32 %v657_v25, %v656_v13 }
 0x139   : > { %v932_v41 = vrot.slane %v879_v32, %v2598_v59  ;;  %v833_v45 = vmul.f32 0.125, %v781_v33  ;;  %v792_v48 = vrot.slane %v791_v38, 2  ;;  %v677_v49 = vmul.f32 0.125, %v648_v42 }
 0x13a   : > { %v774_v21 = vadd.f32 %v773_v31, %v772_v29  ;;  %v782_v51 = vsel %vm550_vm4, %v706_v39, 0.0  ;;  %v640_v52 = vrot.slane %v639_v44, 1  ;;  %v659_v53 = vrot.slane %v658_v34, 2 }
 0x13b   : > { %v991_v57 = vmul.f32 %v932_v41, %v2664_v63  ;;  %v850_v0 = vadd.f32 1e-05, %v833_v45  ;;  %v793_v1 = vadd.f32 %v792_v48, %v791_v38  ;;  %v783_v46 = vrot.slane %v782_v51, 4 }
 0x13c   : > { %v832_v5 = vmul.f32 0.125, %v774_v21  ;;  %v2769_v58 = vsub.f32 %v2639_v54, %v677_v49  ;;  %v641_v47 = vadd.f32 %v640_v52, %v639_v44  ;;  %v660_v56 = vadd.f32 %v659_v53, %v658_v34 }
 0x13d   : > { %v2772_v2 = vadd.f32 %v2690_v61, %v991_v57  ;;  %2308 = vrsqrt.f32 %v850_v0  ;;  %v794_v6 = vrot.slane %v793_v1, 1  ;;  %v784_v7 = vadd.f32 %v783_v46, %v782_v51 }
 0x13e   : > { %v849_v8 = vadd.f32 1e-05, %v832_v5  ;;  %v709_v10 = vmul.f32 %v2769_v58, %v2769_v58  ;;  %v676_v63 = vmul.f32 0.125, %v641_v47  ;;  %v661_v3 = vrot.slane %v660_v56, 1 }
 0x13f   : > { %v795_v35 = vadd.f32 %v794_v6, %v793_v1  ;;  %v785_v13 = vrot.slane %v784_v7, 2  ;;  %v650_v50 = vrot.slane %v649_v28, 4  ;;  %vm1024_vm6 = vcmp.ge.f32.partialorder %v2709_v27, 0.0 }
 0x140   : > { %2310 = vrsqrt.f32 %v849_v8  ;;  %v803_v54 = vsel %vm550_vm4, %v709_v10, 0.0  ;;  %v2779_v18 = vsub.f32 %v2645_v60, %v676_v63  ;;  %v662_v20 = vadd.f32 %v661_v3, %v660_v56 }
 0x141   : > { %v835_v12 = vmul.f32 0.125, %v795_v35  ;;  %v786_v22 = vadd.f32 %v785_v13, %v784_v7  ;;  %v804_v23 = vrot.slane %v803_v54, 4  ;;  %v651_v24 = vadd.f32 %v650_v50, %v649_v28 }
 0x142   : > { %v708_v25 = vmul.f32 %v2779_v18, %v2779_v18  ;;  %v679_v17 = vmul.f32 0.125, %v662_v20  ;;  %v1040_v29 = vmul.f32 0.8, %v2709_v27  ;;  %v1057_v16 = vsel %vm1025_vm5, %v2698_v14, %v2706_v62 }
 0x143   : > { %v852_v32 = vadd.f32 1e-05, %v835_v12  ;;  %v787_v33 = vrot.slane %v786_v22, 1  ;;  %v805_v60 = vadd.f32 %v804_v23, %v803_v54  ;;  %v652_v38 = vrot.slane %v651_v24, 2 }
 0x144   : > { %v796_v42 = vsel %vm550_vm4, %v708_v25, 0.0  ;;  %v2790_v31 = vsub.f32 %v2655_v9, %v679_v17  ;;  %v1056_v28 = vsel %vm1024_vm6, %v2709_v27, %v1040_v29  ;;  %vm1026_vm7 = vcmp.ge.f32.partialorder %v2725_v43, 0.0 }
 0x145   : > { %2312 = vrsqrt.f32 %v852_v32  ;;  %v788_v39 = vadd.f32 %v787_v33, %v786_v22  ;;  %v806_v44 = vrot.slane %v805_v60, 2  ;;  %v797_v34 = vrot.slane %v796_v42, 4  ;;  %2142 = vmatprep.mubr.msk.f32.mxu1 %vm550_vm4, %v1056_v28 }
 0x146   : > { %v711_v14 = vmul.f32 %v2790_v31, %v2790_v31  ;;  %v653_v62 = vadd.f32 %v652_v38, %v651_v24  ;;  %2143 = vmatmul.mubr.msk.f32.vlgmr.msra.gmra.mrb[16].mxu1 %vm550_vm4, %v1057_v16  ;;  %v1042_v9 = vmul.f32 0.8, %v2725_v43  ;;  %vm1027_vm8 = vcmp.ge.f32.partialorder %v2718_v36, 0.0 }
 0x147   : > { %v2309_v41 = vpop.eup %2308  ;;  %v834_v27 = vmul.f32 0.125, %v788_v39  ;;  %v807_v45 = vadd.f32 %v806_v44, %v805_v60  ;;  %v798_v48 = vadd.f32 %v797_v34, %v796_v42  ;;  %v1043_v49 = vmul.f32 0.8, %v2718_v36 }
 0x148   : > { %v882_v21 = vmul.f32 %v2309_v41, %v2680_v26  ;;  %v817_v51 = vsel %vm550_vm4, %v711_v14, 0.0  ;;  %v654_v52 = vrot.slane %v653_v62, 1  ;;  %v1058_v53 = vsel %vm1026_vm7, %v2725_v43, %v1042_v9 }
 0x149   : > { %v851_v57 = vadd.f32 1e-05, %v834_v27  ;;  %v808_v0 = vrot.slane %v807_v45, 1  ;;  %v799_v1 = vrot.slane %v798_v48, 2  ;;  %v818_v46 = vrot.slane %v817_v51, 4  ;;  %2145 = vmatprep.mubr.msk.f32.mxu1 %vm550_vm4, %v1058_v53 }
 0x14a   : > { %v2311_v5 = vpop.eup %2310  ;;  %v944_v47 = vrot.slane %v882_v21, %v2598_v59  ;;  %v655_v56 = vadd.f32 %v654_v52, %v653_v62  ;;  %v1059_v6 = vsel %vm1027_vm8, %v2718_v36, %v1043_v49  ;;  %vm1028_vm9 = vcmp.ge.f32.partialorder %v2740_v37, 0.0 }
 0x14b   : > { %v881_v7 = vmul.f32 %v2311_v5, %v2680_v26  ;;  %2314 = vrsqrt.f32 %v851_v57  ;;  %v809_v43 = vadd.f32 %v808_v0, %v807_v45  ;;  %v800_v8 = vadd.f32 %v799_v1, %v798_v48  ;;  %2146 = vmatmul.mubr.msk.f32.gmra.mrb[18].mxu1 %vm550_vm4, %v1059_v6 }
 0x14c   : > { %v994_v10 = vmul.f32 %v944_v47, %v2702_v19  ;;  %v819_v63 = vadd.f32 %v818_v46, %v817_v51  ;;  %v678_v3 = vmul.f32 0.125, %v655_v56  ;;  %v1044_v35 = vmul.f32 0.8, %v2740_v37 }
 0x14d   : > { %v940_v13 = vrot.slane %v881_v7, %v2598_v59  ;;  %v837_v50 = vmul.f32 0.125, %v809_v43  ;;  %v801_v54 = vrot.slane %v800_v8, 1  ;;  %vm1029_vm10 = vcmp.ge.f32.partialorder %v2735_v55, 0.0 }
 0x14e   : > { %v1017_v36 = vadd.f32 %v2690_v61, %v994_v10  ;;  %v820_v20 = vrot.slane %v819_v63, 2  ;;  %v2822_v12 = vsub.f32 %v2658_v15, %v678_v3  ;;  %v1060_v19 = vsel %vm1028_vm9, %v2740_v37, %v1044_v35 }
 0x14f   : > { %v2313_v22 = vpop.eup %2312  ;;  %v993_v23 = vmul.f32 %v940_v13, %v2722_v40  ;;  %v854_v24 = vadd.f32 1e-05, %v837_v50  ;;  %v802_v25 = vadd.f32 %v801_v54, %v800_v8  ;;  %2148 = vmatprep.mubr.msk.f32.mxu1 %vm550_vm4, %v1060_v19  ;;  %v1045_v17 = vmul.f32 0.8, %v2735_v55 }
 0x150   : > { %v884_v29 = vmul.f32 %v2313_v22, %v2680_v26  ;;  %v821_v16 = vadd.f32 %v820_v20, %v819_v63  ;;  %v710_v15 = vmul.f32 %v2822_v12, %v2822_v12  ;;  %vm1030_vm11 = vcmp.ge.f32.partialorder %v2772_v2, 0.0 }
 0x151   : > { %v1016_v32 = vadd.f32 %v2690_v61, %v993_v23  ;;  %2316 = vrsqrt.f32 %v854_v24  ;;  %v836_v37 = vmul.f32 0.125, %v802_v25  ;;  %v1061_v40 = vsel %vm1029_vm10, %v2735_v55, %v1045_v17 }
 0x152   : > { %v952_v33 = vrot.slane %v884_v29, %v2598_v59  ;;  %v822_v60 = vrot.slane %v821_v16, 1  ;;  %v810_v38 = vsel %vm550_vm4, %v710_v15, 0.0  ;;  %2149 = vmatmul.mubr.msk.f32.gmra.mrb[20].mxu1 %vm550_vm4, %v1061_v40  ;;  %v1046_v42 = vmul.f32 0.8, %v2772_v2 }
 0x153   : > { %v853_v28 = vadd.f32 1e-05, %v836_v37  ;;  %v811_v39 = vrot.slane %v810_v38, 4  ;;  %vm1031_vm12 = vcmp.ge.f32.partialorder %v2751_v11, 0.0  ;;  %v1047_v44 = vmul.f32 0.8, %v2751_v11 }
 0x154   : > { %v996_v34 = vmul.f32 %v952_v33, %v2743_v4  ;;  %v823_v14 = vadd.f32 %v822_v60, %v821_v16  ;;  %v1062_v55 = vsel %vm1030_vm11, %v2772_v2, %v1046_v42  ;;  %vm1032_vm13 = vcmp.ge.f32.partialorder %v1016_v32, 0.0 }
 0x155   : > { %v2315_v62 = vpop.eup %2314  ;;  %2318 = vrsqrt.f32 %v853_v28  ;;  %v812_v9 = vadd.f32 %v811_v39, %v810_v38  ;;  %2151 = vmatprep.mubr.msk.f32.mxu1 %vm550_vm4, %v1062_v55  ;;  %v1063_v41 = vsel %vm1031_vm12, %v2751_v11, %v1047_v44  ;;  %v1048_v27 = vmul.f32 0.8, %v1016_v32  ;;  %vm3102_vm12 = vmpackc.low %vm550_vm4, %vm550_vm4 }
 0x156   : > { %v883_v45 = vmul.f32 %v2315_v62, %v2680_v26  ;;  %v839_v48 = vmul.f32 0.125, %v823_v14  ;;  %2152 = vmatmul.mubr.msk.f32.gmra.mrb[22].mxu1 %vm550_vm4, %v1063_v41  ;;  %vm1033_vm14 = vcmp.ge.f32.partialorder %v1017_v36, 0.0  ;;  %v1049_v21 = vmul.f32 0.8, %v1017_v36 }
 0x157   : > { %v813_v4 = vrot.slane %v812_v9, 2  ;;  %v1064_v49 = vsel %vm1032_vm13, %v1016_v32, %v1048_v27  ;;  %v1019_v52 = vadd.f32 %v2690_v61, %v996_v34 }
 0x158   : > { %v948_v2 = vrot.slane %v883_v45, %v2598_v59  ;;  %v856_v51 = vadd.f32 1e-05, %v839_v48  ;;  %2154 = vmatprep.mubr.msk.f32.mxu1 %vm550_vm4, %v1064_v49  ;;  %v1065_v57 = vsel %vm1033_vm14, %v1017_v36, %v1049_v21 }
 0x159   : > { %v814_v53 = vadd.f32 %v813_v4, %v812_v9  ;;  %v1051_v56 = vmul.f32 0.8, %v1019_v52  ;;  %vm1035_vm0 = vcmp.ge.f32.partialorder %v1019_v52, 0.0 }
 0x15a   : > { %v995_v11 = vmul.f32 %v948_v2, %v2757_v30  ;;  %2320 = vrsqrt.f32 %v856_v51  ;;  %2155 = vmatmul.mubr.msk.f32.gmra.mrb[24].mxu1 %vm550_vm4, %v1065_v57 }
 0x15b   : > { %v2317_v0 = vpop.eup %2316  ;;  %v815_v1 = vrot.slane %v814_v53, 1  ;;  %v1067_v35 = vsel %vm1035_vm0, %v1019_v52, %v1051_v56 }
 0x15c   : > { %v1018_v46 = vadd.f32 %v2690_v61, %v995_v11  ;;  %v886_v5 = vmul.f32 %v2317_v0, %v2680_v26 }
 0x15d   : > { %v816_v47 = vadd.f32 %v815_v1, %v814_v53 }
 0x15e   : > { %v960_v6 = vrot.slane %v886_v5, %v2598_v59  ;;  %vm1034_vm15 = vcmp.ge.f32.partialorder %v1018_v46, 0.0  ;;  %v1050_v7 = vmul.f32 0.8, %v1018_v46 }
 0x15f   : > { %v2319_v43 = vpop.eup %2318  ;;  %v838_v8 = vmul.f32 0.125, %v816_v47 }
 0x160   : > { %v998_v30 = vmul.f32 %v960_v6, %v2769_v58  ;;  %v885_v10 = vmul.f32 %v2319_v43, %v2680_v26  ;;  %v1066_v63 = vsel %vm1034_vm15, %v1018_v46, %v1050_v7 }
 0x161   : > { %v855_v3 = vadd.f32 1e-05, %v838_v8  ;;  %2157 = vmatprep.mubr.msk.f32.mxu1 %vm550_vm4, %v1066_v63 }
 0x162   : > { %v956_v13 = vrot.slane %v885_v10, %v2598_v59  ;;  %2158 = vmatmul.mubr.msk.f32.gmra.mrb[26].mxu1 %vm550_vm4, %v1067_v35  ;;  %v1021_v50 = vadd.f32 %v2690_v61, %v998_v30 }
 0x163   : > { %2322 = vrsqrt.f32 %v855_v3 }
 0x164   : > { %v2321_v54 = vpop.eup %2320  ;;  %v997_v36 = vmul.f32 %v956_v13, %v2779_v18  ;;  %v1053_v19 = vmul.f32 0.8, %v1021_v50  ;;  %vm1037_vm2 = vcmp.ge.f32.partialorder %v1021_v50, 0.0 }
 0x165   : > { %v888_v20 = vmul.f32 %v2321_v54, %v2680_v26 }
 0x166   : > { %v1020_v58 = vadd.f32 %v2690_v61, %v997_v36  ;;  %v1069_v25 = vsel %vm1037_vm2, %v1021_v50, %v1053_v19 }
 0x167   : > { %v968_v23 = vrot.slane %v888_v20, %v2598_v59 }
 0x168   : > { %vm1036_vm1 = vcmp.ge.f32.partialorder %v1020_v58, 0.0  ;;  %v1052_v22 = vmul.f32 0.8, %v1020_v58 }
 0x169   : > { %v1000_v29 = vmul.f32 %v968_v23, %v2790_v31  ;;  %v2421_v31 = vmov 0.0|0.0  }
 0x16a   : > { %v1068_v24 = vsel %vm1036_vm1, %v1020_v58, %v1052_v22  ;;  %2215 = vmatprep.subr.bf16.mxu0 %v2421_v31  ;;  %vm2422_vm1 = vmmov 0  }
 0x16b   : > { %2160 = vmatprep.mubr.msk.f32.mxu1 %vm550_vm4, %v1068_v24  ;;  %v1023_v15 = vadd.f32 %v2690_v61, %v1000_v29 }
 0x16c   : > { %2161 = vmatmul.mubr.msk.f32.gmra.mrb[28].mxu1 %vm550_vm4, %v1069_v25 }
 0x16d   : > { %v2323_v17 = vpop.eup %2322  ;;  %v1055_v40 = vmul.f32 0.8, %v1023_v15  ;;  %vm1039_vm5 = vcmp.ge.f32.partialorder %v1023_v15, 0.0 }
 0x16e   : > { %v887_v18 = vmul.f32 %v2323_v17, %v2680_v26 }
 0x16f   : > { %v1071_v38 = vsel %vm1039_vm5, %v1023_v15, %v1055_v40 }
 0x170   : > { %v964_v16 = vrot.slane %v887_v18, %v2598_v59 }
 0x172   : > { %v999_v32 = vmul.f32 %v964_v16, %v2822_v12 }
 0x174   : > { %v1022_v37 = vadd.f32 %v2690_v61, %v999_v32 }
 0x176   : > { %vm1038_vm3 = vcmp.ge.f32.partialorder %v1022_v37, 0.0  ;;  %v1054_v33 = vmul.f32 0.8, %v1022_v37 }
 0x178   : > { %v1070_v60 = vsel %vm1038_vm3, %v1022_v37, %v1054_v33 }
 0x179   : > { %2163 = vmatprep.mubr.msk.f32.mxu1 %vm550_vm4, %v1070_v60 }
 0x17a   : > { %2164 = vmatmul.mubr.msk.f32.gmra.mrb[30].mxu1 %vm550_vm4, %v1071_v38 }
 0x219   : > { %v2144_v26 = vpop.f32.mrb[16].mxu1 }
 0x21a   : > { %v1276_v42 = vsel %vm550_vm4, %v2144_v26, 0.0  ;;  %v1190_v28 = vpop.f32.mrb[17].mxu1 }
 0x21b   : > { %v1277_v12 = vrot.slane %v1276_v42, 4  ;;  %v1269_v61 = vsel %vm550_vm4, %v1190_v28, 0.0 }
 0x21c   : > { %v1270_v39 = vrot.slane %v1269_v61, 4 }
 0x21d   : > { %v1278_v44 = vadd.f32 %v1277_v12, %v1276_v42 }
 0x21e   : > { %v1271_v34 = vadd.f32 %v1270_v39, %v1269_v61  ;;  %v2147_v14 = vpop.f32.mrb[18].mxu1 }
 0x21f   : > { %v1279_v55 = vrot.slane %v1278_v44, 2  ;;  %v1290_v62 = vsel %vm550_vm4, %v2147_v14, 0.0  ;;  %v1200_v9 = vpop.f32.mrb[19].mxu1 }
 0x220   : > { %v1272_v41 = vrot.slane %v1271_v34, 2  ;;  %v1291_v27 = vrot.slane %v1290_v62, 4  ;;  %v1283_v45 = vsel %vm550_vm4, %v1200_v9, 0.0 }
 0x221   : > { %v1280_v48 = vadd.f32 %v1279_v55, %v1278_v44  ;;  %v1284_v4 = vrot.slane %v1283_v45, 4 }
 0x222   : > { %v1273_v49 = vadd.f32 %v1272_v41, %v1271_v34  ;;  %v1292_v21 = vadd.f32 %v1291_v27, %v1290_v62 }
 0x223   : > { %v1281_v2 = vrot.slane %v1280_v48, 1  ;;  %v1285_v51 = vadd.f32 %v1284_v4, %v1283_v45 }
 0x224   : > { %v1274_v52 = vrot.slane %v1273_v49, 1  ;;  %v1293_v53 = vrot.slane %v1292_v21, 2 }
 0x225   : > { %v1282_v57 = vadd.f32 %v1281_v2, %v1280_v48  ;;  %v1286_v11 = vrot.slane %v1285_v51, 2  ;;  %v2885_v0 = vpop.f32.mrb[20].mxu1 }
 0x226   : > { %v1275_v1 = vadd.f32 %v1274_v52, %v1273_v49  ;;  %v1294_v46 = vadd.f32 %v1293_v53, %v1292_v21  ;;  %v1304_v5 = vsel %vm550_vm4, %v2885_v0, 0.0  ;;  %v2889_v47 = vpop.f32.mrb[21].mxu1 }
 0x227   : > { %v1382_v56 = vmul.f32 0.125, %v1282_v57  ;;  %v1287_v6 = vadd.f32 %v1286_v11, %v1285_v51  ;;  %v1305_v7 = vrot.slane %v1304_v5, 4  ;;  %v1297_v43 = vsel %vm550_vm4, %v2889_v47, 0.0 }
 0x228   : > { %v1381_v8 = vmul.f32 0.125, %v1275_v1  ;;  %v1295_v30 = vrot.slane %v1294_v46, 1  ;;  %v1298_v10 = vrot.slane %v1297_v43, 4 }
 0x229   : > { %v2893_v63 = vsub.f32 %v2144_v26, %v1382_v56  ;;  %v1288_v3 = vrot.slane %v1287_v6, 1  ;;  %v1306_v35 = vadd.f32 %v1305_v7, %v1304_v5  ;;  %v2895_v13 = vpop.f32.mrb[22].mxu1 }
 0x22a   : > { %v2897_v50 = vsub.f32 %v1190_v28, %v1381_v8  ;;  %v1296_v54 = vadd.f32 %v1295_v30, %v1294_v46  ;;  %v1299_v36 = vadd.f32 %v1298_v10, %v1297_v43  ;;  %v1318_v20 = vsel %vm550_vm4, %v2895_v13, 0.0  ;;  %v2901_v58 = vpop.f32.mrb[23].mxu1 }
 0x22b   : > { %v1414_v19 = vmul.f32 %v2893_v63, %v2893_v63  ;;  %v1289_v22 = vadd.f32 %v1288_v3, %v1287_v6  ;;  %v1307_v23 = vrot.slane %v1306_v35, 2  ;;  %v1319_v24 = vrot.slane %v1318_v20, 4 }
 0x22c   : > { %v1413_v25 = vmul.f32 %v2897_v50, %v2897_v50  ;;  %v1384_v17 = vmul.f32 0.125, %v1296_v54  ;;  %v1300_v29 = vrot.slane %v1299_v36, 2  ;;  %v1311_v18 = vsel %vm550_vm4, %v2901_v58, 0.0 }
 0x22d   : > { %v1436_v16 = vsel %vm550_vm4, %v1414_v19, 0.0  ;;  %v1383_v15 = vmul.f32 0.125, %v1289_v22  ;;  %v1308_v32 = vadd.f32 %v1307_v23, %v1306_v35  ;;  %v1320_v37 = vadd.f32 %v1319_v24, %v1318_v20  ;;  %v2910_v40 = vpop.f32.mrb[24].mxu1 }
 0x22e   : > { %v1437_v33 = vrot.slane %v1436_v16, 4  ;;  %v1429_v60 = vsel %vm550_vm4, %v1413_v25, 0.0  ;;  %v2913_v38 = vsub.f32 %v2147_v14, %v1384_v17  ;;  %v1301_v26 = vadd.f32 %v1300_v29, %v1299_v36  ;;  %v2915_v42 = vpop.f32.mrb[25].mxu1 }
 0x22f   : > { %v1430_v28 = vrot.slane %v1429_v60, 4  ;;  %v2917_v12 = vsub.f32 %v1200_v9, %v1383_v15  ;;  %v1309_v61 = vrot.slane %v1308_v32, 1  ;;  %v1321_v39 = vrot.slane %v1320_v37, 2 }
 0x230   : > { %v1438_v44 = vadd.f32 %v1437_v33, %v1436_v16  ;;  %v1416_v34 = vmul.f32 %v2913_v38, %v2913_v38  ;;  %v1302_v55 = vrot.slane %v1301_v26, 1  ;;  %v1312_v62 = vrot.slane %v1311_v18, 4 }
 0x231   : > { %v1431_v41 = vadd.f32 %v1430_v28, %v1429_v60  ;;  %v1415_v27 = vmul.f32 %v2917_v12, %v2917_v12  ;;  %v1310_v14 = vadd.f32 %v1309_v61, %v1308_v32  ;;  %v1322_v45 = vadd.f32 %v1321_v39, %v1320_v37 }
 0x232   : > { %v1439_v48 = vrot.slane %v1438_v44, 2  ;;  %v1450_v4 = vsel %vm550_vm4, %v1416_v34, 0.0  ;;  %v1303_v49 = vadd.f32 %v1302_v55, %v1301_v26  ;;  %v1313_v9 = vadd.f32 %v1312_v62, %v1311_v18 }
 0x233   : > { %v1432_v21 = vrot.slane %v1431_v41, 2  ;;  %v1451_v2 = vrot.slane %v1450_v4, 4  ;;  %v1443_v51 = vsel %vm550_vm4, %v1415_v27, 0.0  ;;  %v1386_v52 = vmul.f32 0.125, %v1310_v14 }
 0x234   : > { %v1440_v53 = vadd.f32 %v1439_v48, %v1438_v44  ;;  %v1444_v57 = vrot.slane %v1443_v51, 4  ;;  %v1385_v11 = vmul.f32 0.125, %v1303_v49  ;;  %v1323_v1 = vrot.slane %v1322_v45, 1 }
 0x235   : > { %v1433_v46 = vadd.f32 %v1432_v21, %v1431_v41  ;;  %v1452_v5 = vadd.f32 %v1451_v2, %v1450_v4  ;;  %v2926_v56 = vsub.f32 %v2885_v0, %v1386_v52  ;;  %v1314_v6 = vrot.slane %v1313_v9, 2  ;;  %v2928_v7 = vpop.f32.mrb[26].mxu1 }
 0x236   : > { %v1441_v43 = vrot.slane %v1440_v53, 1  ;;  %v1445_v8 = vadd.f32 %v1444_v57, %v1443_v51  ;;  %v2931_v30 = vsub.f32 %v2889_v47, %v1385_v11  ;;  %v1324_v10 = vadd.f32 %v1323_v1, %v1322_v45  ;;  %v2933_v3 = vpop.f32.mrb[27].mxu1 }
 0x237   : > { %v1434_v35 = vrot.slane %v1433_v46, 1  ;;  %v1453_v54 = vrot.slane %v1452_v5, 2  ;;  %v1418_v36 = vmul.f32 %v2926_v56, %v2926_v56  ;;  %v1315_v20 = vadd.f32 %v1314_v6, %v1313_v9 }
 0x238   : > { %v1442_v19 = vadd.f32 %v1441_v43, %v1440_v53  ;;  %v1446_v0 = vrot.slane %v1445_v8, 2  ;;  %v1417_v22 = vmul.f32 %v2931_v30, %v2931_v30  ;;  %v1388_v23 = vmul.f32 0.125, %v1324_v10 }
 0x239   : > { %v1435_v24 = vadd.f32 %v1434_v35, %v1433_v46  ;;  %v1454_v25 = vadd.f32 %v1453_v54, %v1452_v5  ;;  %v1464_v47 = vsel %vm550_vm4, %v1418_v36, 0.0  ;;  %v1316_v17 = vrot.slane %v1315_v20, 1 }
 0x23a   : > { %v1542_v29 = vmul.f32 0.125, %v1442_v19  ;;  %v1447_v18 = vadd.f32 %v1446_v0, %v1445_v8  ;;  %v1465_v16 = vrot.slane %v1464_v47, 4  ;;  %v1457_v15 = vsel %vm550_vm4, %v1417_v22, 0.0 }
 0x23b   : > { %v1541_v32 = vmul.f32 0.125, %v1435_v24  ;;  %v1455_v37 = vrot.slane %v1454_v25, 1  ;;  %v1458_v33 = vrot.slane %v1457_v15, 4  ;;  %v2942_v60 = vsub.f32 %v2895_v13, %v1388_v23 }
 0x23c   : > { %v1559_v26 = vadd.f32 1e-05, %v1542_v29  ;;  %v1448_v28 = vrot.slane %v1447_v18, 1  ;;  %v1466_v61 = vadd.f32 %v1465_v16, %v1464_v47  ;;  %v1317_v39 = vadd.f32 %v1316_v17, %v1315_v20 }
 0x23d   : > { %v1558_v44 = vadd.f32 1e-05, %v1541_v32  ;;  %v1456_v34 = vadd.f32 %v1455_v37, %v1454_v25  ;;  %v1459_v55 = vadd.f32 %v1458_v33, %v1457_v15  ;;  %v1420_v62 = vmul.f32 %v2942_v60, %v2942_v60  ;;  %v2968_v15 = vld [vmem:[%s3263_s5] sm:$0x1] }
 0x23e   : > { %2324 = vrsqrt.f32 %v1559_v26  ;;  %v1449_v41 = vadd.f32 %v1448_v28, %v1447_v18  ;;  %v1467_v27 = vrot.slane %v1466_v61, 2  ;;  %v1387_v14 = vmul.f32 0.125, %v1317_v39 }
 0x23f   : > { %2326 = vrsqrt.f32 %v1558_v44  ;;  %v1544_v45 = vmul.f32 0.125, %v1456_v34  ;;  %v1460_v48 = vrot.slane %v1459_v55, 2  ;;  %v1478_v13 = vsel %vm550_vm4, %v1420_v62, 0.0  ;;  %v2947_v4 = vpop.f32.mrb[28].mxu1 }
 0x240   : > { %v1543_v49 = vmul.f32 0.125, %v1449_v41  ;;  %v1468_v9 = vadd.f32 %v1467_v27, %v1466_v61  ;;  %v1479_v21 = vrot.slane %v1478_v13, 4  ;;  %v2950_v2 = vsub.f32 %v2901_v58, %v1387_v14  ;;  %v2952_v51 = vpop.f32.mrb[29].mxu1 }
 0x241   : > { %v1561_v52 = vadd.f32 1e-05, %v1544_v45  ;;  %v1461_v53 = vadd.f32 %v1460_v48, %v1459_v55  ;;  %v1332_v57 = vsel %vm550_vm4, %v2910_v40, 0.0  ;;  %v1325_v11 = vsel %vm550_vm4, %v2915_v42, 0.0 }
 0x242   : > { %v1560_v1 = vadd.f32 1e-05, %v1543_v49  ;;  %v1469_v46 = vrot.slane %v1468_v9, 1  ;;  %v1480_v5 = vadd.f32 %v1479_v21, %v1478_v13  ;;  %v1419_v6 = vmul.f32 %v2950_v2, %v2950_v2 }
 0x243   : > { %2328 = vrsqrt.f32 %v1561_v52  ;;  %v1462_v43 = vrot.slane %v1461_v53, 1  ;;  %v1333_v58 = vrot.slane %v1332_v57, 4  ;;  %v1326_v8 = vrot.slane %v1325_v11, 4 }
 0x244   : > { %2330 = vrsqrt.f32 %v1560_v1  ;;  %v1470_v10 = vadd.f32 %v1469_v46, %v1468_v9  ;;  %v1481_v35 = vrot.slane %v1480_v5, 2  ;;  %v1471_v54 = vsel %vm550_vm4, %v1419_v6, 0.0 }
 0x245   : > { %v1463_v36 = vadd.f32 %v1462_v43, %v1461_v53  ;;  %v1472_v20 = vrot.slane %v1471_v54, 4  ;;  %v1334_v19 = vadd.f32 %v1333_v58, %v1332_v57  ;;  %v1327_v0 = vadd.f32 %v1326_v8, %v1325_v11 }
 0x246   : > { %v1546_v22 = vmul.f32 0.125, %v1470_v10  ;;  %v1482_v23 = vadd.f32 %v1481_v35, %v1480_v5  ;;  %v1346_v24 = vsel %vm550_vm4, %v2928_v7, 0.0  ;;  %v1339_v25 = vsel %vm550_vm4, %v2933_v3, 0.0 }
 0x247   : > { %v1545_v47 = vmul.f32 0.125, %v1463_v36  ;;  %v1473_v17 = vadd.f32 %v1472_v20, %v1471_v54  ;;  %v1335_v29 = vrot.slane %v1334_v19, 2  ;;  %v1328_v18 = vrot.slane %v1327_v0, 2 }
 0x248   : > { %v2325_v16 = vpop.eup %2324  ;;  %v1563_v32 = vadd.f32 1e-05, %v1546_v22  ;;  %v1483_v37 = vrot.slane %v1482_v23, 1  ;;  %v1347_v39 = vrot.slane %v1346_v24, 4  ;;  %v1340_v55 = vrot.slane %v1339_v25, 4 }
 0x249   : > { %v2327_v33 = vpop.eup %2326  ;;  %v1562_v26 = vadd.f32 1e-05, %v1545_v47  ;;  %v1474_v28 = vrot.slane %v1473_v17, 2  ;;  %v1336_v61 = vadd.f32 %v1335_v29, %v1334_v19  ;;  %v1329_v34 = vadd.f32 %v1328_v18, %v1327_v0  ;;  %v2997_v18 = vld [vmem:[%s3264_s6] ss:$0 sm:$0xff] }
 0x24a   : > { %2332 = vrsqrt.f32 %v1563_v32  ;;  %v1484_v44 = vadd.f32 %v1483_v37, %v1482_v23  ;;  %v1591_v62 = vmul.f32 %v2325_v16, %v2968_v15  ;;  %v1590_v13 = vmul.f32 %v2327_v33, %v2968_v15 }
 0x24b   : > { %2334 = vrsqrt.f32 %v1562_v26  ;;  %v1475_v41 = vadd.f32 %v1474_v28, %v1473_v17  ;;  %v1337_v27 = vrot.slane %v1336_v61, 1  ;;  %v1330_v45 = vrot.slane %v1329_v34, 1 }
 0x24c   : > { %v1548_v14 = vmul.f32 0.125, %v1484_v44  ;;  %v1348_v21 = vadd.f32 %v1347_v39, %v1346_v24  ;;  %v1341_v46 = vadd.f32 %v1340_v55, %v1339_v25  ;;  %v1629_v6 = vrot.slane %v1591_v62, %v2598_v59 }
 0x24d   : > { %v2329_v48 = vpop.eup %2328  ;;  %v1476_v49 = vrot.slane %v1475_v41, 1  ;;  %v1338_v9 = vadd.f32 %v1337_v27, %v1336_v61  ;;  %v2972_v52 = vpop.f32.mrb[30].mxu1  ;;  %v1331_v1 = vadd.f32 %v1330_v45, %v1329_v34  ;;  %v1625_v0 = vrot.slane %v1590_v13, %v2598_v59 }
 0x24e   : > { %v2331_v53 = vpop.eup %2330  ;;  %v1593_v57 = vmul.f32 %v2329_v48, %v2968_v15  ;;  %v1565_v11 = vadd.f32 1e-05, %v1548_v14  ;;  %v2975_v5 = vpop.f32.mrb[31].mxu1  ;;  %v1349_v19 = vrot.slane %v1348_v21, 2  ;;  %v1342_v23 = vrot.slane %v1341_v46, 2 }
 0x24f   : > { %v1592_v43 = vmul.f32 %v2331_v53, %v2968_v15  ;;  %v1477_v58 = vadd.f32 %v1476_v49, %v1475_v41  ;;  %v1390_v8 = vmul.f32 0.125, %v1338_v9  ;;  %v1389_v35 = vmul.f32 0.125, %v1331_v1 }
 0x250   : > { %v1637_v10 = vrot.slane %v1593_v57, %v2598_v59  ;;  %2336 = vrsqrt.f32 %v1565_v11  ;;  %v1360_v24 = vsel %vm550_vm4, %v2947_v4, 0.0  ;;  %v1703_v25 = vmul.f32 %v1629_v6, %v2893_v63 }
 0x251   : > { %v1633_v54 = vrot.slane %v1592_v43, %v2598_v59  ;;  %v1547_v36 = vmul.f32 0.125, %v1477_v58  ;;  %v2982_v20 = vsub.f32 %v2910_v40, %v1390_v8  ;;  %v2986_v22 = vsub.f32 %v2915_v42, %v1389_v35 }
 0x252   : > { %v1705_v47 = vmul.f32 %v1637_v10, %v2913_v38  ;;  %v1350_v32 = vadd.f32 %v1349_v19, %v1348_v21  ;;  %v1343_v37 = vadd.f32 %v1342_v23, %v1341_v46  ;;  %v1361_v26 = vrot.slane %v1360_v24, 4 }
 0x253   : > { %v1564_v17 = vadd.f32 1e-05, %v1547_v36  ;;  %v1422_v29 = vmul.f32 %v2982_v20, %v2982_v20  ;;  %v1704_v42 = vmul.f32 %v1633_v54, %v2917_v12  ;;  %v1421_v16 = vmul.f32 %v2986_v22, %v2986_v22 }
 0x254   : > { %v2333_v40 = vpop.eup %2332  ;;  %v1702_v28 = vmul.f32 %v1625_v0, %v2897_v50  ;;  %v3007_v44 = vadd.f32 %v2997_v18, %v1703_v25  ;;  %v3010_v12 = vadd.f32 %v2997_v18, %v1705_v47  ;;  %v1351_v14 = vrot.slane %v1350_v32, 1 }
 0x255   : > { %v2335_v63 = vpop.eup %2334  ;;  %v1595_v38 = vmul.f32 %v2333_v40, %v2968_v15  ;;  %2338 = vrsqrt.f32 %v1564_v17  ;;  %v1492_v33 = vsel %vm550_vm4, %v1422_v29, 0.0  ;;  %v1485_v55 = vsel %vm550_vm4, %v1421_v16, 0.0 }
 0x256   : > { %v1594_v61 = vmul.f32 %v2335_v63, %v2968_v15  ;;  %v1493_v39 = vrot.slane %v1492_v33, 4  ;;  %v1486_v27 = vrot.slane %v1485_v55, 4  ;;  %v3016_v50 = vadd.f32 %v2997_v18, %v1704_v42 }
 0x257   : > { %v1645_v34 = vrot.slane %v1595_v38, %v2598_v59  ;;  %v1344_v48 = vrot.slane %v1343_v37, 1  ;;  %v1362_v13 = vadd.f32 %v1361_v26, %v1360_v24  ;;  %v1352_v57 = vadd.f32 %v1351_v14, %v1350_v32 }
 0x258   : > { %v1641_v62 = vrot.slane %v1594_v61, %v2598_v59  ;;  %v1494_v41 = vadd.f32 %v1493_v39, %v1492_v33  ;;  %v1487_v53 = vadd.f32 %v1486_v27, %v1485_v55  ;;  %v3021_v11 = vadd.f32 %v2997_v18, %v1702_v28 }
 0x259   : > { %v1707_v45 = vmul.f32 %v1645_v34, %v2926_v56  ;;  %v1345_v46 = vadd.f32 %v1344_v48, %v1343_v37  ;;  %v1363_v6 = vrot.slane %v1362_v13, 2  ;;  %v3025_v43 = vmul.f32 0.8, %v3010_v12 }
 0x25a   : > { %v2337_v49 = vpop.eup %2336  ;;  %v1706_v9 = vmul.f32 %v1641_v62, %v2931_v30  ;;  %v1495_v21 = vrot.slane %v1494_v41, 2  ;;  %v1488_v56 = vrot.slane %v1487_v53, 2  ;;  %v1392_v8 = vmul.f32 0.125, %v1352_v57 }
 0x25b   : > { %v1597_v1 = vmul.f32 %v2337_v49, %v2968_v15  ;;  %v3028_v10 = vadd.f32 %v2997_v18, %v1707_v45  ;;  %v1391_v35 = vmul.f32 0.125, %v1345_v46  ;;  %v1353_v54 = vsel %vm550_vm4, %v2952_v51, 0.0 }
 0x25c   : > { %v1496_v58 = vadd.f32 %v1495_v21, %v1494_v41  ;;  %v3034_v36 = vmul.f32 0.8, %v3016_v50  ;;  %v3037_v19 = vadd.f32 %v2997_v18, %v1706_v9  ;;  %v1489_v23 = vadd.f32 %v1488_v56, %v1487_v53 }
 0x25d   : > { %v1653_v30 = vrot.slane %v1597_v1, %v2598_v59  ;;  %v3041_v47 = vsub.f32 %v2928_v7, %v1392_v8  ;;  %v3044_v17 = vsub.f32 %v2933_v3, %v1391_v35  ;;  %v1364_v29 = vadd.f32 %v1363_v6, %v1362_v13 }
 0x25e   : > { %v1497_v0 = vrot.slane %v1496_v58, 1  ;;  %v1490_v16 = vrot.slane %v1489_v23, 1  ;;  %v1354_v32 = vrot.slane %v1353_v54, 4  ;;  %v3048_v37 = vmul.f32 0.8, %v3028_v10 }
 0x25f   : > { %v2339_v24 = vpop.eup %2338  ;;  %v1709_v25 = vmul.f32 %v1653_v30, %v2942_v60  ;;  %v1424_v63 = vmul.f32 %v3041_v47, %v3041_v47  ;;  %v1423_v60 = vmul.f32 %v3044_v17, %v3044_v17  ;;  %v1365_v7 = vrot.slane %v1364_v29, 1 }
 0x260   : > { %v1596_v40 = vmul.f32 %v2339_v24, %v2968_v15  ;;  %v1498_v42 = vadd.f32 %v1497_v0, %v1496_v58  ;;  %v1491_v33 = vadd.f32 %v1490_v16, %v1489_v23  ;;  %v1355_v26 = vadd.f32 %v1354_v32, %v1353_v54 }
 0x261   : > { %v3056_v28 = vmul.f32 0.8, %v3037_v19  ;;  %v3059_v61 = vadd.f32 %v2997_v18, %v1709_v25  ;;  %v1506_v39 = vsel %vm550_vm4, %v1424_v63, 0.0  ;;  %v1499_v34 = vsel %vm550_vm4, %v1423_v60, 0.0 }
 0x262   : > { %v1649_v38 = vrot.slane %v1596_v40, %v2598_v59  ;;  %v1550_v3 = vmul.f32 0.125, %v1498_v42  ;;  %v1549_v41 = vmul.f32 0.125, %v1491_v33  ;;  %v1507_v27 = vrot.slane %v1506_v39, 4 }
 0x263   : > { %v1500_v14 = vrot.slane %v1499_v34, 4  ;;  %v1366_v45 = vadd.f32 %v1365_v7, %v1364_v29  ;;  %v1356_v48 = vrot.slane %v1355_v26, 2  ;;  %v1374_v13 = vsel %vm550_vm4, %v2972_v52, 0.0 }
 0x264   : > { %v1708_v55 = vmul.f32 %v1649_v38, %v2950_v2  ;;  %v1567_v62 = vadd.f32 1e-05, %v1550_v3  ;;  %v1566_v9 = vadd.f32 1e-05, %v1549_v41  ;;  %v1508_v21 = vadd.f32 %v1507_v27, %v1506_v39 }
 0x265   : > { %vm1743_vm6 = vcmp.ge.f32.partialorder %v3016_v50, 0.0  ;;  %v1501_v53 = vadd.f32 %v1500_v14, %v1499_v34  ;;  %v1394_v57 = vmul.f32 0.125, %v1366_v45  ;;  %v1357_v2 = vadd.f32 %v1356_v48, %v1355_v26 }
 0x266   : > { %v3067_v49 = vadd.f32 %v2997_v18, %v1708_v55  ;;  %2340 = vrsqrt.f32 %v1567_v62  ;;  %v1375_v1 = vrot.slane %v1374_v13, 4  ;;  %v3071_v46 = vmul.f32 0.8, %v3059_v61 }
 0x267   : > { %2342 = vrsqrt.f32 %v1566_v9  ;;  %v1509_v58 = vrot.slane %v1508_v21, 2  ;;  %v1502_v56 = vrot.slane %v1501_v53, 2  ;;  %v3077_v8 = vsub.f32 %v2947_v4, %v1394_v57 }
 0x268   : > { %v3074_v6 = vmul.f32 0.8, %v3067_v49  ;;  %v1358_v30 = vrot.slane %v1357_v2, 1  ;;  %v1376_v35 = vadd.f32 %v1375_v1, %v1374_v13  ;;  %v1367_v0 = vsel %vm550_vm4, %v2975_v5, 0.0 }
 0x269   : > { %v1510_v54 = vadd.f32 %v1509_v58, %v1508_v21  ;;  %vm1741_vm7 = vcmp.ge.f32.partialorder %v3021_v11, 0.0  ;;  %vm1742_vm8 = vcmp.ge.f32.partialorder %v3007_v44, 0.0  ;;  %vm1744_vm9 = vcmp.ge.f32.partialorder %v3010_v12, 0.0 }
 0x26a   : > { %v1503_v23 = vadd.f32 %v1502_v56, %v1501_v53  ;;  %v1426_v24 = vmul.f32 %v3077_v8, %v3077_v8  ;;  %v1359_v25 = vadd.f32 %v1358_v30, %v1357_v2  ;;  %v1377_v29 = vrot.slane %v1376_v35, 2 }
 0x26b   : > { %v1511_v4 = vrot.slane %v1510_v54, 1  ;;  %v1368_v40 = vrot.slane %v1367_v0, 4  ;;  %v1757_v42 = vmul.f32 0.8, %v3021_v11  ;;  %v1758_v16 = vmul.f32 0.8, %v3007_v44 }
 0x26c   : > { %vm1745_vm10 = vcmp.ge.f32.partialorder %v3037_v19, 0.0  ;;  %v1504_v32 = vrot.slane %v1503_v23, 1  ;;  %v1520_v63 = vsel %vm550_vm4, %v1426_v24, 0.0  ;;  %v1393_v60 = vmul.f32 0.125, %v1359_v25 }
 0x26d   : > { %v1378_v7 = vadd.f32 %v1377_v29, %v1376_v35  ;;  %v1512_v38 = vadd.f32 %v1511_v4, %v1510_v54  ;;  %v1521_v3 = vrot.slane %v1520_v63, 4  ;;  %v1369_v33 = vadd.f32 %v1368_v40, %v1367_v0 }
 0x26e   : > { %v1773_v26 = vsel %vm1741_vm7, %v3021_v11, %v1757_v42  ;;  %vm1746_vm11 = vcmp.ge.f32.partialorder %v3028_v10, 0.0  ;;  %v1505_v39 = vadd.f32 %v1504_v32, %v1503_v23  ;;  %v3095_v34 = vsub.f32 %v2952_v51, %v1393_v60 }
 0x26f   : > { %v1379_v55 = vrot.slane %v1378_v7, 1  ;;  %v1774_v62 = vsel %vm1742_vm8, %v3007_v44, %v1758_v16  ;;  %v1552_v14 = vmul.f32 0.125, %v1512_v38  ;;  %v1522_v11 = vadd.f32 %v1521_v3, %v1520_v63 }
 0x270   : > { %v2341_v27 = vpop.eup %2340  ;;  %v1370_v45 = vrot.slane %v1369_v33, 2  ;;  %v2216_v48 = vpack.c.bf16 %v1774_v62, %v1773_v26  ;;  %vm1747_vm13 = vcmp.ge.f32.partialorder %v3067_v49, 0.0  ;;  %v1551_v13 = vmul.f32 0.125, %v1505_v39 }
 0x271   : > { %v1599_v51 = vmul.f32 %v2341_v27, %v2968_v15  ;;  %v1425_v9 = vmul.f32 %v3095_v34, %v3095_v34  ;;  %v1380_v44 = vadd.f32 %v1379_v55, %v1378_v7  ;;  %v2343_v21 = vpop.eup %2342  ;;  %vm1748_vm14 = vcmp.ge.f32.partialorder %v3059_v61, 0.0 }
 0x272   : > { %v1569_v53 = vadd.f32 1e-05, %v1552_v14  ;;  %v1523_v57 = vrot.slane %v1522_v11, 2  ;;  %v1371_v2 = vadd.f32 %v1370_v45, %v1369_v33  ;;  %2218 = vmatpush3.bf16.xpose.msk.msra.mxu0 %vm3102_vm12, %v2216_v48  ;;  %v1775_v1 = vsel %vm1743_vm6, %v3016_v50, %v3034_v36 }
 0x273   : > { %v1661_v58 = vrot.slane %v1599_v51, %v2598_v59  ;;  %v1598_v56 = vmul.f32 %v2343_v21, %v2968_v15  ;;  %v1568_v30 = vadd.f32 1e-05, %v1551_v13  ;;  %v1513_v35 = vsel %vm550_vm4, %v1425_v9, 0.0  ;;  %2219 = vmatprep.subr.bf16.mxu0 %v2421_v31 }
 0x274   : > { %2344 = vrsqrt.f32 %v1569_v53  ;;  %v1524_v54 = vadd.f32 %v1523_v57, %v1522_v11  ;;  %v1514_v0 = vrot.slane %v1513_v35, 4  ;;  %v1396_v23 = vmul.f32 0.125, %v1380_v44 }
 0x275   : > { %v1711_v24 = vmul.f32 %v1661_v58, %v2982_v20  ;;  %v1657_v25 = vrot.slane %v1598_v56, %v2598_v59  ;;  %2346 = vrsqrt.f32 %v1568_v30  ;;  %v1372_v29 = vrot.slane %v1371_v2, 1 }
 0x276   : > { %v1525_v50 = vrot.slane %v1524_v54, 1  ;;  %v1515_v36 = vadd.f32 %v1514_v0, %v1513_v35  ;;  %v3124_v4 = vsub.f32 %v2972_v52, %v1396_v23  ;;  %v1776_v40 = vsel %vm1744_vm9, %v3010_v12, %v3025_v43 }
 0x277   : > { %v1734_v42 = vadd.f32 %v2997_v18, %v1711_v24  ;;  %v1710_v16 = vmul.f32 %v1657_v25, %v2986_v22  ;;  %v1373_v32 = vadd.f32 %v1372_v29, %v1371_v2  ;;  %v2220_v20 = vpack.c.bf16 %v1776_v40, %v1775_v1  ;;  %v1790_v1 = vld [vmem:[#allocation2] sm:$0x1] }
 0x278   : > { %v1526_v63 = vadd.f32 %v1525_v50, %v1524_v54  ;;  %v1516_v60 = vrot.slane %v1515_v36, 2  ;;  %v1428_v7 = vmul.f32 %v3124_v4, %v3124_v4  ;;  %v1777_v52 = vsel %vm1745_vm10, %v3037_v19, %v3056_v28 }
 0x279   : > { %vm1750_vm15 = vcmp.ge.f32.partialorder %v1734_v42, 0.0  ;;  %v1766_v38 = vmul.f32 0.8, %v1734_v42  ;;  %v1733_v12 = vadd.f32 %v2997_v18, %v1710_v16  ;;  %v1395_v43 = vmul.f32 0.125, %v1373_v32 }
 0x27a   : > { %v1554_v3 = vmul.f32 0.125, %v1526_v63  ;;  %v1517_v33 = vadd.f32 %v1516_v60, %v1515_v36  ;;  %v1534_v22 = vsel %vm550_vm4, %v1428_v7, 0.0  ;;  %2222 = vmatpush3.bf16.xpose.msk.msra.mxu0 %vm3102_vm12, %v2220_v20  ;;  %v1778_v26 = vsel %vm1746_vm11, %v3028_v10, %v3048_v37 }
 0x27b   : > { %vm1749_vm0 = vcmp.ge.f32.partialorder %v1733_v12, 0.0  ;;  %v1765_v39 = vmul.f32 0.8, %v1733_v12  ;;  %v1535_v19 = vrot.slane %v1534_v22, 4  ;;  %v3147_v28 = vsub.f32 %v2975_v5, %v1395_v43  ;;  %2223 = vmatprep.subr.bf16.mxu0 %v2421_v31 }
 0x27c   : > { %v1571_v55 = vadd.f32 1e-05, %v1554_v3  ;;  %v1518_v62 = vrot.slane %v1517_v33, 1  ;;  %v2224_v27 = vpack.c.bf16 %v1778_v26, %v1777_v52  ;;  %v1779_v14 = vsel %vm1747_vm13, %v3067_v49, %v3074_v6 }
 0x27d   : > { %v1536_v11 = vadd.f32 %v1535_v19, %v1534_v22  ;;  %v1427_v10 = vmul.f32 %v3147_v28, %v3147_v28  ;;  %v1780_v5 = vsel %vm1748_vm14, %v3059_v61, %v3071_v46  ;;  %v3160_v37 = vsel %vm1749_vm0, %v1733_v12, %v1765_v39 }
 0x27e   : > { %v2345_v45 = vpop.eup %2344  ;;  %2348 = vrsqrt.f32 %v1571_v55  ;;  %v1519_v48 = vadd.f32 %v1518_v62, %v1517_v33  ;;  %v2228_v51 = vpack.c.bf16 %v1780_v5, %v1779_v14  ;;  %v1782_v13 = vsel %vm1750_vm15, %v1734_v42, %v1766_v38 }
 0x27f   : > { %v2347_v9 = vpop.eup %2346  ;;  %v1601_v49 = vmul.f32 %v2345_v45, %v2968_v15  ;;  %v1537_v6 = vrot.slane %v1536_v11, 2  ;;  %v1527_v44 = vsel %vm550_vm4, %v1427_v10, 0.0  ;;  %v2232_v21 = vpack.c.bf16 %v1782_v13, %v3160_v37 }
 0x280   : > { %v1600_v53 = vmul.f32 %v2347_v9, %v2968_v15  ;;  %v1553_v57 = vmul.f32 0.125, %v1519_v48  ;;  %v1528_v61 = vrot.slane %v1527_v44, 4  ;;  %v2423_v35 = vmov 0.0  }
 0x281   : > { %v1669_v46 = vrot.slane %v1601_v49, %v2598_v59  ;;  %v1538_v2 = vadd.f32 %v1537_v6, %v1536_v11  ;;  %2198 = vmatprep.mubr.msk.f32.mxu0 %vm2422_vm1, %v2423_v35  ;;  %v2424_v23 = vmov 0  }
 0x282   : > { %v1665_v58 = vrot.slane %v1600_v53, %v2598_v59  ;;  %v1570_v56 = vadd.f32 1e-05, %v1553_v57  ;;  %v1529_v30 = vadd.f32 %v1528_v61, %v1527_v44  ;;  %2226 = vmatpush3.bf16.xpose.msk.msra.mxu0 %vm3102_vm12, %v2224_v27  ;;  %2291 = vset.pattern.permute.xlu0 %v2424_v23 }
 0x283   : > { %v1713_v54 = vmul.f32 %v1669_v46, %v3041_v47  ;;  %v1539_v0 = vrot.slane %v1538_v2, 1  ;;  %2227 = vmatprep.subr.bf16.mxu0 %v2421_v31  ;;  %1793 = vperm.xlu0 %2291, %v1790_v1  }
 0x284   : > { %v1712_v24 = vmul.f32 %v1665_v58, %v3044_v17  ;;  %2350 = vrsqrt.f32 %v1570_v56  ;;  %v1530_v25 = vrot.slane %v1529_v30, 2 }
 0x285   : > { %v1736_v29 = vadd.f32 %v2997_v18, %v1713_v54  ;;  %v1540_v50 = vadd.f32 %v1539_v0, %v1538_v2 }
 0x286   : > { %v1735_v36 = vadd.f32 %v2997_v18, %v1712_v24  ;;  %v1531_v40 = vadd.f32 %v1530_v25, %v1529_v30 }
 0x287   : > { %vm1752_vm2 = vcmp.ge.f32.partialorder %v1736_v29, 0.0  ;;  %v1768_v42 = vmul.f32 0.8, %v1736_v29  ;;  %v1556_v16 = vmul.f32 0.125, %v1540_v50 }
 0x288   : > { %v2349_v47 = vpop.eup %2348  ;;  %vm1751_vm3 = vcmp.ge.f32.partialorder %v1735_v36, 0.0  ;;  %v1767_v32 = vmul.f32 0.8, %v1735_v36  ;;  %v1532_v20 = vrot.slane %v1531_v40, 1 }
 0x289   : > { %v1603_v63 = vmul.f32 %v2349_v47, %v2968_v15  ;;  %v1573_v60 = vadd.f32 1e-05, %v1556_v16  ;;  %v1784_v17 = vsel %vm1752_vm2, %v1736_v29, %v1768_v42 }
 0x28a   : > { %v1533_v7 = vadd.f32 %v1532_v20, %v1531_v40  ;;  %2230 = vmatpush3.bf16.xpose.msk.msra.mxu0 %vm3102_vm12, %v2228_v51  ;;  %v1783_v52 = vsel %vm1751_vm3, %v1735_v36, %v1767_v32 }
 0x28b   : > { %v1677_v38 = vrot.slane %v1603_v63, %v2598_v59  ;;  %2352 = vrsqrt.f32 %v1573_v60  ;;  %2231 = vmatprep.subr.bf16.mxu0 %v2421_v31  ;;  %v2236_v12 = vpack.c.bf16 %v1784_v17, %v1783_v52 }
 0x28c   : > { %v1555_v43 = vmul.f32 0.125, %v1533_v7 }
 0x28d   : > { %v1715_v3 = vmul.f32 %v1677_v38, %v3077_v8 }
 0x28e   : > { %v2351_v33 = vpop.eup %2350  ;;  %v1572_v22 = vadd.f32 1e-05, %v1555_v43 }
 0x28f   : > { %v1738_v26 = vadd.f32 %v2997_v18, %v1715_v3  ;;  %v1602_v39 = vmul.f32 %v2351_v33, %v2968_v15 }
 0x290   : > { %2354 = vrsqrt.f32 %v1572_v22 }
 0x291   : > { %v1673_v19 = vrot.slane %v1602_v39, %v2598_v59  ;;  %v1770_v55 = vmul.f32 0.8, %v1738_v26  ;;  %vm1754_vm5 = vcmp.ge.f32.partialorder %v1738_v26, 0.0 }
 0x292   : > { %2234 = vmatpush3.bf16.xpose.msk.msra.mxu0 %vm3102_vm12, %v2232_v21 }
 0x293   : > { %v1714_v62 = vmul.f32 %v1673_v19, %v3095_v34  ;;  %2235 = vmatprep.subr.bf16.mxu0 %v2421_v31  ;;  %v1786_v10 = vsel %vm1754_vm5, %v1738_v26, %v1770_v55 }
 0x295   : > { %v2353_v27 = vpop.eup %2352  ;;  %v1737_v8 = vadd.f32 %v2997_v18, %v1714_v62 }
 0x296   : > { %v1605_v14 = vmul.f32 %v2353_v27, %v2968_v15 }
 0x297   : > { %vm1753_vm6 = vcmp.ge.f32.partialorder %v1737_v8, 0.0  ;;  %v1769_v11 = vmul.f32 0.8, %v1737_v8 }
 0x298   : > { %v1685_v5 = vrot.slane %v1605_v14, %v2598_v59 }
 0x299   : > { %v1785_v37 = vsel %vm1753_vm6, %v1737_v8, %v1769_v11 }
 0x29a   : > { %v2355_v45 = vpop.eup %2354  ;;  %v1717_v48 = vmul.f32 %v1685_v5, %v3124_v4  ;;  %2238 = vmatpush3.bf16.xpose.msk.msra.mxu0 %vm3102_vm12, %v2236_v12  ;;  %v2240_v34 = vpack.c.bf16 %v1786_v10, %v1785_v37 }
 0x29b   : > { %v1604_v51 = vmul.f32 %v2355_v45, %v2968_v15  ;;  %2239 = vmatprep.subr.bf16.mxu0 %v2421_v31 }
 0x29c   : > { %v1740_v13 = vadd.f32 %v2997_v18, %v1717_v48 }
 0x29d   : > { %v1681_v9 = vrot.slane %v1604_v51, %v2598_v59 }
 0x29e   : > { %v1772_v49 = vmul.f32 0.8, %v1740_v13  ;;  %vm1756_vm7 = vcmp.ge.f32.partialorder %v1740_v13, 0.0 }
 0x29f   : > { %v1716_v6 = vmul.f32 %v1681_v9, %v3147_v28  ;;  %v1789_v28 = vld [vmem:[%s3265_s7] sm:$0x1] }
 0x2a0   : > { %v1788_v15 = vsel %vm1756_vm7, %v1740_v13, %v1772_v49 }
 0x2a1   : > { %v1739_v44 = vadd.f32 %v2997_v18, %v1716_v6 }
 0x2a2   : > { %2242 = vmatpush3.bf16.xpose.msk.msra.mxu0 %vm3102_vm12, %v2240_v34 }
 0x2a3   : > { %vm1755_vm8 = vcmp.ge.f32.partialorder %v1739_v44, 0.0  ;;  %v1771_v4 = vmul.f32 0.8, %v1739_v44  ;;  %2243 = vmatprep.subr.bf16.mxu0 %v2421_v31 }
 0x2a5   : > { %v1787_v21 = vsel %vm1755_vm8, %v1739_v44, %v1771_v4 }
 0x2a6   : > { %v2244_v53 = vpack.c.bf16 %v1788_v15, %v1787_v21 }
 0x2aa   : > { %2246 = vmatpush3.bf16.xpose.msk.msra.mxu0 %vm3102_vm12, %v2244_v53 }
 0x2b1   : > { %2199 = vmatmul.mubr.msk.f32.vlgmr.msra.gmra.mrb[0].mxu0 %vm550_vm4, %v1789_v28 }
 0x302   : > { %v1794_v18 = vpop.permute.xlu0 %1793 }
 0x303   : > { %v1799_v57 = vrot.slane %v1794_v18, %v2598_v59 }
 0x384   : > { %v1917_v31 = vpop.f32.mrb[0].mxu0 }
 0x385   : > { %v1918_v61 = vadd.f32 %v1917_v31, %v1799_v57  ;;  %v2200_v46 = vpop.f32.mrb[1].mxu0 }
 0x387   : > { %1921 = vst [vmem:[%s327_s24] sm:$0x1] %v1918_v61 }
 0x388   : > { %2369 = shalt.err (!%p2366_p3)
}
 0x389   : > { %s2370_s26 = scalar_lea.hbm %s3216_s29, 16  ;;  %s2374_s23 = scalar_lea.hbm %s3267_s9, 32 }
 0x38a   : > { %p2371_p4 = scmp.ne.s32.totalorder %s3216_s29, %s2370_s26  ;;  %p2375_p9 = scmp.lt.u32.totalorder %s3216_s29, %s3267_s9 }
 0x38b   : > { %p2376_p10 = scmp.lt.u32.totalorder %s2374_s23, %s2370_s26  ;;  %p2378_p12 = scmp.lt.u32.totalorder %s2370_s26, %s3216_s29 }
 0x38c   : > { %p2372_p7 = pnand %p2371_p4, %p2514_p5 }
 0x38d   : > { %p2377_p11 = por %p2376_p10, %p2375_p9 }
 0x38e   : > { %p2373_p8 = pneg %p2372_p7 }
 0x38f   : > { %p2379_p13 = por %p2378_p12, %p2377_p11 }
 0x391   : > { %p2380_p0 = pnand %p2379_p13, %p2373_p8 }
 0x393   : > { %2383 = shalt.err (!%p2380_p0)
}
 0x394   : > { %2247 = dma.vmem_to_hbm [thread:$0]  (%p2514_p5), %s3218_s25, 16, %s3216_s29, %s1923_s30  }
 0x395 PF: > { %p2253_p1 = scmp.ge.s32.totalorder %s2418_s14, 2  ;;  %s1947_s28 = sand.u32 1, %s2406_s11  }
 0x396   : > { %s1948_s10 = scalar_lea.sflag [#allocation4], %s1947_s28 }
 0x397   : > { %p2250_p2 = pnand %p2253_p1, %p2518_p6 }
 0x399   : > { %2401 = dma.done.wait (!%p2250_p2), %s1948_s10, 16  }
 0x39a   : > { %2403 = vsyncadd (!%p2250_p2), %s1948_s10, 4294967280  ;;  %p21_p3 = scmp.ge.s32.totalorder %s2502_s16, 4   ;;  %s3272_s11 = smov %s2410_s12 }
 0x39b   : > { %s3273_s12 = smov %s2414_s13  ;;  %s3274_s13 = smov %s2512_s19 }
 0x39c   : > { %s3275_s14 = smov %s2502_s16  ;;  %23 = sbr.rel (!%p21_p3) target bundleno = 6 (0x6), region = 91 }
 0x3a3   :  { %1952 = vsyncpa [#allocation4], 1 }
 0x3a4   :  { %1954 = vsyncpa [#allocation4 + $0x1], 1 }

</bundles_post_ra>
